<compile_context>
chip_gen: v5e
topology: v5e:2x2
jax: 0.10.0
libtpu: 0.0.40
codegen_flags: <defaults>
</compile_context>

<pallas_src>
import math

import numpy as np
import jax
import jax.numpy as jnp
from jax import lax
from jax.experimental import pallas as pl
from jax.experimental.pallas import tpu as pltpu

WINDOW_SIZE = 11
SIGMA = 1.5
PAD = WINDOW_SIZE // 2
_TOP = 8                      # sublane-aligned top pad inside the H-conv scratch (>= PAD)
C1 = 0.01 ** 2
C2 = 0.03 ** 2


def _gaussian_1d(window_size=WINDOW_SIZE, sigma=SIGMA):
    vals = [math.exp(-((x - window_size // 2) ** 2) / (2.0 * sigma ** 2))
            for x in range(window_size)]
    s = sum(vals)
    return [v / s for v in vals]


_G = _gaussian_1d()           # same 1-D taps the PyTorch module builds (window = g (x) g)


def _conv_matrix(n):
    """Banded Toeplitz A (n, n): (x @ A.T) == zero-"same"-padded 1-D Gaussian conv
    along the last axis of x.  The zero padding of F.conv2d(padding=ws//2) is
    folded into the truncated bands, so no explicit padding is needed."""
    a = np.zeros((n, n), dtype=np.float32)
    for i in range(n):
        for k in range(WINDOW_SIZE):
            j = i + k - PAD
            if 0 <= j < n:
                a[i, j] = _G[k]
    return a


# ----------------------------- Pallas kernel ---------------------------------
def _ssim_kernel(tw_ref, x1_ref, x2_ref, o_ref, z_ref, pad_ref):
    # tw_ref : (W, W) right-applied Toeplitz for the W-axis (lane) blur
    # x refs : (1, C_blk, H, W) blocks of img1 / img2
    # o_ref  : (1, 1, C_blk, W) per-channel partial sums (reduced over H)
    # z_ref  : VMEM (4*C_blk*H, W) stacked pre-blur quantities (matmul LHS)
    # pad_ref: VMEM (4*C_blk, H + 2*_TOP, W) zero-padded buffer for the H blur
    c_blk, h, w = x1_ref.shape[1], x1_ref.shape[2], x1_ref.shape[3]
    chh = c_blk * h
    q = 4 * c_blk

    x1 = x1_ref[0].astype(jnp.float32)          # (C_blk, H, W)
    x2 = x2_ref[0].astype(jnp.float32)

    # Stack the four pre-blur quantities along rows (sublane axis) via
    # slice-stores into a persistent VMEM scratch.  Blur is linear, so
    # blur(x1^2) + blur(x2^2) is carried as a single stacked quantity.
    #   rows [0:chh)     -> x1
    #   rows [chh:2chh)  -> x2
    #   rows [2chh:3chh) -> x1*x1 + x2*x2
    #   rows [3chh:4chh) -> x1*x2
    z_ref[0 * chh:1 * chh, :] = x1.reshape(chh, w)
    z_ref[1 * chh:2 * chh, :] = x2.reshape(chh, w)
    z_ref[2 * chh:3 * chh, :] = (x1 * x1 + x2 * x2).reshape(chh, w)
    z_ref[3 * chh:4 * chh, :] = (x1 * x2).reshape(chh, w)

    # ---- W-axis (lane) Gaussian blur: ONE MXU matmul, M = 4*C_blk*H ----
    zw = jnp.dot(z_ref[...], tw_ref[...], preferred_element_type=jnp.float32)

    # ---- H-axis (sublane) Gaussian blur: unrolled 11-tap FMA ----
    # Zero "same" padding is provided by zeroed rows above/below each slab in
    # the padded scratch; the image rows land at a sublane-aligned offset.
    zero_rows = jnp.zeros((q, _TOP, w), jnp.float32)
    pad_ref[:, 0:_TOP, :] = zero_rows
    pad_ref[:, _TOP + h:_TOP + h + _TOP, :] = zero_rows
    pad_ref[:, _TOP:_TOP + h, :] = zw.reshape(q, h, w)

    base = _TOP - PAD
    y = _G[0] * pad_ref[:, base:base + h, :]
    for k in range(1, WINDOW_SIZE):
        y = y + _G[k] * pad_ref[:, base + k:base + k + h, :]
    # y: (4*C_blk, H, W) = [mu1 | mu2 | blur(x1^2)+blur(x2^2) | blur(x1*x2)]

    mu1 = y[0 * c_blk:1 * c_blk]
    mu2 = y[1 * c_blk:2 * c_blk]
    e_sq = y[2 * c_blk:3 * c_blk]
    e12 = y[3 * c_blk:4 * c_blk]

    mu1mu2 = mu1 * mu2
    mu_sq = mu1 * mu1 + mu2 * mu2
    sigma_sum = e_sq - mu_sq          # sigma1_sq + sigma2_sq
    sigma12 = e12 - mu1mu2

    num = (2.0 * mu1mu2 + C1) * (2.0 * sigma12 + C2)
    den = (mu_sq + C1) * (sigma_sum + C2)

    inv = pl.reciprocal(den, approx=True)    # EUP slot
    inv = inv * (2.0 - den * inv)            # one Newton step -> ~f32 accuracy
    ssim_map = num * inv                     # (C_blk, H, W)

    # Per-channel partial sums, reduced over H in-kernel; W reduced in wrapper.
    for ci in range(c_blk):
        o_ref[0, 0, ci:ci + 1, :] = jnp.sum(ssim_map[ci], axis=0, keepdims=True)


# ------------------------------- wrapper --------------------------------------
def _vmem_limit_bytes():
    # Per-generation scoped-VMEM budget: v5e/v6e have 128 MiB physical,
    # v7x 64 MiB.  Leave headroom for Mosaic-internal scratch.
    try:
        cap = int(pltpu.get_tpu_info().vmem_capacity_bytes)
        return int(min(0.75 * cap, 112 * 1024 * 1024))
    except Exception:
        return 48 * 1024 * 1024


def _pick_c_blk(c, n, h, w, in_itemsize, vmem_limit):
    """Largest divisor of C whose per-step working set fits the VMEM budget,
    while keeping the flattened grid length >= 2 (v7x 2-TC balance)."""
    def vmem_need(cb):
        img = cb * h * w
        return (2 * 2 * img * in_itemsize            # x1, x2 double-buffered input blocks
                + 4 * img * 4                        # z scratch (4 stacked quantities)
                + 4 * cb * (h + 2 * _TOP) * w * 4    # zero-padded H-conv scratch
                + 16 * img * 4                       # live f32 temporaries (zw, taps, ssim)
                + 2 * w * w * 4                      # Toeplitz tw (constant, 2 buffers)
                + 2 * cb * w * 4)                    # output block

    divisors = [d for d in range(1, c + 1) if c % d == 0]
    cb = 1
    for d in sorted(divisors, reverse=True):
        if vmem_need(d) <= int(0.6 * vmem_limit):
            cb = d
            break
    while cb > 1 and n * (c // cb) < 2:
        cb = max(d for d in divisors if d < cb)
    return cb


def ssim(img1, img2, size_average=True):
    assert img1.shape == img2.shape and img1.ndim == 4
    n, c, h, w = img1.shape

    vmem_limit = _vmem_limit_bytes()
    c_blk = _pick_c_blk(c, n, h, w, jnp.dtype(img1.dtype).itemsize, vmem_limit)
    c_groups = c // c_blk

    tw = jnp.asarray(_conv_matrix(w).T)      # (W, W): y = x @ tw  (W-axis conv)

    partials = pl.pallas_call(
        _ssim_kernel,
        out_shape=jax.ShapeDtypeStruct((n, c_groups, c_blk, w), jnp.float32),
        grid=(n, c_groups),
        in_specs=[
            pl.BlockSpec((w, w), lambda i, j: (0, 0)),
            pl.BlockSpec((1, c_blk, h, w), lambda i, j: (i, j, 0, 0)),
            pl.BlockSpec((1, c_blk, h, w), lambda i, j: (i, j, 0, 0)),
        ],
        out_specs=pl.BlockSpec((1, 1, c_blk, w), lambda i, j: (i, j, 0, 0)),
        scratch_shapes=[
            pltpu.VMEM((4 * c_blk * h, w), jnp.float32),
            pltpu.VMEM((4 * c_blk, h + 2 * _TOP, w), jnp.float32),
        ],
        compiler_params=pltpu.CompilerParams(
            dimension_semantics=("parallel", "parallel"),
            vmem_limit_bytes=vmem_limit),
    )(tw, img1, img2)

    per_channel = jnp.sum(partials, axis=-1).reshape(n, c)     # sum over W
    if size_average:
        return jnp.sum(per_channel) / float(n * c * h * w)
    # size_average=False == ssim_map.mean(1).mean(1).mean(1): mean over (C, H, W)
    return jnp.sum(per_channel, axis=1) / float(c * h * w)


# ------------------------- pure-JAX reference (sanity check) ------------------
def _ref_conv1d(x, axis, out_len):
    acc = _G[0] * lax.slice_in_dim(x, 0, out_len, axis=axis)
    for k in range(1, WINDOW_SIZE):
        acc = acc + _G[k] * lax.slice_in_dim(x, k, k + out_len, axis=axis)
    return acc


def _ref_ssim(img1, img2, size_average=True):
    n, c, h, w = img1.shape
    p = PAD
    pad_cfg = ((0, 0), (0, 0), (p, p), (p, p))

    def blur(x):
        xp = jnp.pad(x, pad_cfg)
        y = _ref_conv1d(xp, 3, w)
        y = _ref_conv1d(y, 2, h)
        return y

    mu1, mu2 = blur(img1), blur(img2)
    s11 = blur(img1 * img1) - mu1 * mu1
    s22 = blur(img2 * img2) - mu2 * mu2
    s12 = blur(img1 * img2) - mu1 * mu2
    ssim_map = ((2 * mu1 * mu2 + C1) * (2 * s12 + C2)) / (
        (mu1 * mu1 + mu2 * mu2 + C1) * (s11 + s22 + C2))
    if size_average:
        return jnp.mean(ssim_map)
    return jnp.mean(ssim_map, axis=(1, 2, 3))


if __name__ == "__main__":
    key = jax.random.PRNGKey(0)
    k1, k2 = jax.random.split(key)
    # small shapes consistent with the module's 4-D (N, C, H, W) inputs
    n, c, h, w = 2, 4, 16, 16
    img1 = jax.random.uniform(k1, (n, c, h, w), dtype=jnp.float32)
    img2 = jax.random.uniform(k2, (n, c, h, w), dtype=jnp.float32)

    out = jax.block_until_ready(ssim(img1, img2, size_average=True))
    out_b = jax.block_until_ready(ssim(img1, img2, size_average=False))

    ref = jax.block_until_ready(_ref_ssim(img1, img2, size_average=True))
    ref_b = jax.block_until_ready(_ref_ssim(img1, img2, size_average=False))

    # Tolerance sized to absorb possible reduced-precision operand rounding in
    # the single MXU matmul (the H-axis blur and all elementwise math are f32).
    TOL = 5e-3
    assert jnp.isfinite(out), "non-finite SSIM"
    assert abs(float(out) - float(ref)) < TOL, (float(out), float(ref))
    assert out_b.shape == (n,)
    assert float(jnp.max(jnp.abs(out_b - ref_b))) < TOL, (out_b, ref_b)

    print("KERNEL_OK")
</pallas_src>

<mosaic_0001>
module attributes {stable_mosaic.version = 11 : i64} {
  func.func @_ssim_kernel(%arg0: i32, %arg1: i32, %arg2: memref<16x16xf32, #tpu.memory_space<vmem>>, %arg3: memref<1x4x16x16xf32, #tpu.memory_space<vmem>>, %arg4: memref<1x4x16x16xf32, #tpu.memory_space<vmem>>, %arg5: memref<1x1x4x16xf32, #tpu.memory_space<vmem>>, %arg6: memref<256x16xf32, #tpu.memory_space<vmem>>, %arg7: memref<16x32x16xf32, #tpu.memory_space<vmem>>) attributes {dimension_semantics = [#tpu.dimension_semantics<parallel>, #tpu.dimension_semantics<parallel>], iteration_bounds = array<i64: 2, 1>, scalar_prefetch = 0 : i64, scratch_operands = 2 : i64, tpu.core_type = #tpu.core_type<tc>, window_params = [{pipeline_mode = #tpu.pipeline_mode<synchronous>, transform_indices = @transform_0, window_bounds = array<i64: 16, 16>}, {transform_indices = @transform_1, window_bounds = array<i64: 1, 4, 16, 16>}, {transform_indices = @transform_2, window_bounds = array<i64: 1, 4, 16, 16>}, {transform_indices = @transform_3, window_bounds = array<i64: 1, 1, 4, 16>}]} {
    %c0 = arith.constant 0 : index
    %c0_0 = arith.constant 0 : index
    %c0_1 = arith.constant 0 : index
    %c0_2 = arith.constant 0 : index
    %0 = vector.load %arg3[%c0, %c0_0, %c0_1, %c0_2] : memref<1x4x16x16xf32, #tpu.memory_space<vmem>>, vector<1x4x16x16xf32>
    %1 = vector.shape_cast %0 : vector<1x4x16x16xf32> to vector<4x16x16xf32>
    %c0_3 = arith.constant 0 : index
    %c0_4 = arith.constant 0 : index
    %c0_5 = arith.constant 0 : index
    %c0_6 = arith.constant 0 : index
    %2 = vector.load %arg4[%c0_3, %c0_4, %c0_5, %c0_6] : memref<1x4x16x16xf32, #tpu.memory_space<vmem>>, vector<1x4x16x16xf32>
    %3 = vector.shape_cast %2 : vector<1x4x16x16xf32> to vector<4x16x16xf32>
    %4 = vector.shape_cast %1 : vector<4x16x16xf32> to vector<64x16xf32>
    %c0_7 = arith.constant 0 : index
    %c0_8 = arith.constant 0 : index
    %5 = vector.load %arg6[%c0_7, %c0_8] : memref<256x16xf32, #tpu.memory_space<vmem>>, vector<64x16xf32>
    tpu.vector_store %arg6[%c0_7, %c0_8], %4 {strides = array<i32>} : memref<256x16xf32, #tpu.memory_space<vmem>>, vector<64x16xf32>,
    %6 = vector.shape_cast %3 : vector<4x16x16xf32> to vector<64x16xf32>
    %c64 = arith.constant 64 : index
    %c0_9 = arith.constant 0 : index
    %7 = vector.load %arg6[%c64, %c0_9] : memref<256x16xf32, #tpu.memory_space<vmem>>, vector<64x16xf32>
    tpu.vector_store %arg6[%c64, %c0_9], %6 {strides = array<i32>} : memref<256x16xf32, #tpu.memory_space<vmem>>, vector<64x16xf32>,
    %8 = arith.mulf %1, %1 : vector<4x16x16xf32>
    %9 = arith.mulf %3, %3 : vector<4x16x16xf32>
    %10 = arith.addf %8, %9 : vector<4x16x16xf32>
    %11 = vector.shape_cast %10 : vector<4x16x16xf32> to vector<64x16xf32>
    %c128 = arith.constant 128 : index
    %c0_10 = arith.constant 0 : index
    %12 = vector.load %arg6[%c128, %c0_10] : memref<256x16xf32, #tpu.memory_space<vmem>>, vector<64x16xf32>
    tpu.vector_store %arg6[%c128, %c0_10], %11 {strides = array<i32>} : memref<256x16xf32, #tpu.memory_space<vmem>>, vector<64x16xf32>,
    %13 = arith.mulf %1, %3 : vector<4x16x16xf32>
    %14 = vector.shape_cast %13 : vector<4x16x16xf32> to vector<64x16xf32>
    %c192 = arith.constant 192 : index
    %c0_11 = arith.constant 0 : index
    %15 = vector.load %arg6[%c192, %c0_11] : memref<256x16xf32, #tpu.memory_space<vmem>>, vector<64x16xf32>
    tpu.vector_store %arg6[%c192, %c0_11], %14 {strides = array<i32>} : memref<256x16xf32, #tpu.memory_space<vmem>>, vector<64x16xf32>,
    %c0_12 = arith.constant 0 : index
    %c0_13 = arith.constant 0 : index
    %16 = vector.load %arg6[%c0_12, %c0_13] : memref<256x16xf32, #tpu.memory_space<vmem>>, vector<256x16xf32>
    %c0_14 = arith.constant 0 : index
    %c0_15 = arith.constant 0 : index
    %17 = vector.load %arg2[%c0_14, %c0_15] : memref<16x16xf32, #tpu.memory_space<vmem>>, vector<16x16xf32>
    %cst = arith.constant dense<0.000000e+00> : vector<256x16xf32>
    %18 = tpu.matmul %16, %17, %cst {dimension_numbers = #tpu.dot_dimension_numbers<[1], [0], [0], [1], [0, 0, 1, 1], [], []>} : vector<256x16xf32>, vector<16x16xf32>, vector<256x16xf32> -> vector<256x16xf32>
    %cst_16 = arith.constant 0.000000e+00 : f32
    %19 = vector.broadcast %cst_16 : f32 to vector<16x8x16xf32>
    %c0_17 = arith.constant 0 : index
    %c0_18 = arith.constant 0 : index
    %c0_19 = arith.constant 0 : index
    %20 = vector.load %arg7[%c0_17, %c0_18, %c0_19] : memref<16x32x16xf32, #tpu.memory_space<vmem>>, vector<16x8x16xf32>
    tpu.vector_store %arg7[%c0_17, %c0_18, %c0_19], %19 {strides = array<i32>} : memref<16x32x16xf32, #tpu.memory_space<vmem>>, vector<16x8x16xf32>,
    %c0_20 = arith.constant 0 : index
    %c24 = arith.constant 24 : index
    %c0_21 = arith.constant 0 : index
    %21 = vector.load %arg7[%c0_20, %c24, %c0_21] : memref<16x32x16xf32, #tpu.memory_space<vmem>>, vector<16x8x16xf32>
    tpu.vector_store %arg7[%c0_20, %c24, %c0_21], %19 {strides = array<i32>} : memref<16x32x16xf32, #tpu.memory_space<vmem>>, vector<16x8x16xf32>,
    %22 = vector.shape_cast %18 : vector<256x16xf32> to vector<16x16x16xf32>
    %c0_22 = arith.constant 0 : index
    %c8 = arith.constant 8 : index
    %c0_23 = arith.constant 0 : index
    %23 = vector.load %arg7[%c0_22, %c8, %c0_23] : memref<16x32x16xf32, #tpu.memory_space<vmem>>, vector<16x16x16xf32>
    tpu.vector_store %arg7[%c0_22, %c8, %c0_23], %22 {strides = array<i32>} : memref<16x32x16xf32, #tpu.memory_space<vmem>>, vector<16x16x16xf32>,
    %c0_24 = arith.constant 0 : index
    %c3 = arith.constant 3 : index
    %c0_25 = arith.constant 0 : index
    %24 = vector.load %arg7[%c0_24, %c3, %c0_25] : memref<16x32x16xf32, #tpu.memory_space<vmem>>, vector<16x16x16xf32>
    %cst_26 = arith.constant 0.00102838012 : f32
    %25 = vector.broadcast %cst_26 : f32 to vector<16x16x16xf32>
    %26 = arith.mulf %25, %24 : vector<16x16x16xf32>
    %c0_27 = arith.constant 0 : index
    %c4 = arith.constant 4 : index
    %c0_28 = arith.constant 0 : index
    %27 = vector.load %arg7[%c0_27, %c4, %c0_28] : memref<16x32x16xf32, #tpu.memory_space<vmem>>, vector<16x16x16xf32>
    %cst_29 = arith.constant 0.00759875821 : f32
    %28 = vector.broadcast %cst_29 : f32 to vector<16x16x16xf32>
    %29 = arith.mulf %28, %27 : vector<16x16x16xf32>
    %30 = arith.addf %26, %29 : vector<16x16x16xf32>
    %c0_30 = arith.constant 0 : index
    %c5 = arith.constant 5 : index
    %c0_31 = arith.constant 0 : index
    %31 = vector.load %arg7[%c0_30, %c5, %c0_31] : memref<16x32x16xf32, #tpu.memory_space<vmem>>, vector<16x16x16xf32>
    %cst_32 = arith.constant 0.0360007733 : f32
    %32 = vector.broadcast %cst_32 : f32 to vector<16x16x16xf32>
    %33 = arith.mulf %32, %31 : vector<16x16x16xf32>
    %34 = arith.addf %30, %33 : vector<16x16x16xf32>
    %c0_33 = arith.constant 0 : index
    %c6 = arith.constant 6 : index
    %c0_34 = arith.constant 0 : index
    %35 = vector.load %arg7[%c0_33, %c6, %c0_34] : memref<16x32x16xf32, #tpu.memory_space<vmem>>, vector<16x16x16xf32>
    %cst_35 = arith.constant 0.109360687 : f32
    %36 = vector.broadcast %cst_35 : f32 to vector<16x16x16xf32>
    %37 = arith.mulf %36, %35 : vector<16x16x16xf32>
    %38 = arith.addf %34, %37 : vector<16x16x16xf32>
    %c0_36 = arith.constant 0 : index
    %c7 = arith.constant 7 : index
    %c0_37 = arith.constant 0 : index
    %39 = vector.load %arg7[%c0_36, %c7, %c0_37] : memref<16x32x16xf32, #tpu.memory_space<vmem>>, vector<16x16x16xf32>
    %cst_38 = arith.constant 0.213005543 : f32
    %40 = vector.broadcast %cst_38 : f32 to vector<16x16x16xf32>
    %41 = arith.mulf %40, %39 : vector<16x16x16xf32>
    %42 = arith.addf %38, %41 : vector<16x16x16xf32>
    %c0_39 = arith.constant 0 : index
    %c8_40 = arith.constant 8 : index
    %c0_41 = arith.constant 0 : index
    %43 = vector.load %arg7[%c0_39, %c8_40, %c0_41] : memref<16x32x16xf32, #tpu.memory_space<vmem>>, vector<16x16x16xf32>
    %cst_42 = arith.constant 0.266011715 : f32
    %44 = vector.broadcast %cst_42 : f32 to vector<16x16x16xf32>
    %45 = arith.mulf %44, %43 : vector<16x16x16xf32>
    %46 = arith.addf %42, %45 : vector<16x16x16xf32>
    %c0_43 = arith.constant 0 : index
    %c9 = arith.constant 9 : index
    %c0_44 = arith.constant 0 : index
    %47 = vector.load %arg7[%c0_43, %c9, %c0_44] : memref<16x32x16xf32, #tpu.memory_space<vmem>>, vector<16x16x16xf32>
    %cst_45 = arith.constant 0.213005543 : f32
    %48 = vector.broadcast %cst_45 : f32 to vector<16x16x16xf32>
    %49 = arith.mulf %48, %47 : vector<16x16x16xf32>
    %50 = arith.addf %46, %49 : vector<16x16x16xf32>
    %c0_46 = arith.constant 0 : index
    %c10 = arith.constant 10 : index
    %c0_47 = arith.constant 0 : index
    %51 = vector.load %arg7[%c0_46, %c10, %c0_47] : memref<16x32x16xf32, #tpu.memory_space<vmem>>, vector<16x16x16xf32>
    %cst_48 = arith.constant 0.109360687 : f32
    %52 = vector.broadcast %cst_48 : f32 to vector<16x16x16xf32>
    %53 = arith.mulf %52, %51 : vector<16x16x16xf32>
    %54 = arith.addf %50, %53 : vector<16x16x16xf32>
    %c0_49 = arith.constant 0 : index
    %c11 = arith.constant 11 : index
    %c0_50 = arith.constant 0 : index
    %55 = vector.load %arg7[%c0_49, %c11, %c0_50] : memref<16x32x16xf32, #tpu.memory_space<vmem>>, vector<16x16x16xf32>
    %cst_51 = arith.constant 0.0360007733 : f32
    %56 = vector.broadcast %cst_51 : f32 to vector<16x16x16xf32>
    %57 = arith.mulf %56, %55 : vector<16x16x16xf32>
    %58 = arith.addf %54, %57 : vector<16x16x16xf32>
    %c0_52 = arith.constant 0 : index
    %c12 = arith.constant 12 : index
    %c0_53 = arith.constant 0 : index
    %59 = vector.load %arg7[%c0_52, %c12, %c0_53] : memref<16x32x16xf32, #tpu.memory_space<vmem>>, vector<16x16x16xf32>
    %cst_54 = arith.constant 0.00759875821 : f32
    %60 = vector.broadcast %cst_54 : f32 to vector<16x16x16xf32>
    %61 = arith.mulf %60, %59 : vector<16x16x16xf32>
    %62 = arith.addf %58, %61 : vector<16x16x16xf32>
    %c0_55 = arith.constant 0 : index
    %c13 = arith.constant 13 : index
    %c0_56 = arith.constant 0 : index
    %63 = vector.load %arg7[%c0_55, %c13, %c0_56] : memref<16x32x16xf32, #tpu.memory_space<vmem>>, vector<16x16x16xf32>
    %cst_57 = arith.constant 0.00102838012 : f32
    %64 = vector.broadcast %cst_57 : f32 to vector<16x16x16xf32>
    %65 = arith.mulf %64, %63 : vector<16x16x16xf32>
    %66 = arith.addf %62, %65 : vector<16x16x16xf32>
    %67 = vector.extract_strided_slice %66 {offsets = [0, 0, 0], sizes = [4, 16, 16], strides = [1, 1, 1]} : vector<16x16x16xf32> to vector<4x16x16xf32>
    %68 = vector.extract_strided_slice %66 {offsets = [4, 0, 0], sizes = [4, 16, 16], strides = [1, 1, 1]} : vector<16x16x16xf32> to vector<4x16x16xf32>
    %69 = vector.extract_strided_slice %66 {offsets = [8, 0, 0], sizes = [4, 16, 16], strides = [1, 1, 1]} : vector<16x16x16xf32> to vector<4x16x16xf32>
    %70 = vector.extract_strided_slice %66 {offsets = [12, 0, 0], sizes = [4, 16, 16], strides = [1, 1, 1]} : vector<16x16x16xf32> to vector<4x16x16xf32>
    %71 = arith.mulf %67, %68 : vector<4x16x16xf32>
    %72 = arith.mulf %67, %67 : vector<4x16x16xf32>
    %73 = arith.mulf %68, %68 : vector<4x16x16xf32>
    %74 = arith.addf %72, %73 : vector<4x16x16xf32>
    %75 = arith.subf %69, %74 : vector<4x16x16xf32>
    %76 = arith.subf %70, %71 : vector<4x16x16xf32>
    %cst_58 = arith.constant 2.000000e+00 : f32
    %77 = vector.broadcast %cst_58 : f32 to vector<4x16x16xf32>
    %78 = arith.mulf %77, %71 : vector<4x16x16xf32>
    %cst_59 = arith.constant 9.99999974E-5 : f32
    %79 = vector.broadcast %cst_59 : f32 to vector<4x16x16xf32>
    %80 = arith.addf %78, %79 : vector<4x16x16xf32>
    %cst_60 = arith.constant 2.000000e+00 : f32
    %81 = vector.broadcast %cst_60 : f32 to vector<4x16x16xf32>
    %82 = arith.mulf %81, %76 : vector<4x16x16xf32>
    %cst_61 = arith.constant 8.99999984E-4 : f32
    %83 = vector.broadcast %cst_61 : f32 to vector<4x16x16xf32>
    %84 = arith.addf %82, %83 : vector<4x16x16xf32>
    %85 = arith.mulf %80, %84 : vector<4x16x16xf32>
    %cst_62 = arith.constant 9.99999974E-5 : f32
    %86 = vector.broadcast %cst_62 : f32 to vector<4x16x16xf32>
    %87 = arith.addf %74, %86 : vector<4x16x16xf32>
    %cst_63 = arith.constant 8.99999984E-4 : f32
    %88 = vector.broadcast %cst_63 : f32 to vector<4x16x16xf32>
    %89 = arith.addf %75, %88 : vector<4x16x16xf32>
    %90 = arith.mulf %87, %89 : vector<4x16x16xf32>
    %91 = tpu.reciprocal %90 {approx = true} : vector<4x16x16xf32> -> vector<4x16x16xf32>
    %92 = arith.mulf %90, %91 : vector<4x16x16xf32>
    %cst_64 = arith.constant 2.000000e+00 : f32
    %93 = vector.broadcast %cst_64 : f32 to vector<4x16x16xf32>
    %94 = arith.subf %93, %92 : vector<4x16x16xf32>
    %95 = arith.mulf %91, %94 : vector<4x16x16xf32>
    %96 = arith.mulf %85, %95 : vector<4x16x16xf32>
    %97 = vector.extract_strided_slice %96 {offsets = [0, 0, 0], sizes = [1, 16, 16], strides = [1, 1, 1]} : vector<4x16x16xf32> to vector<1x16x16xf32>
    %98 = vector.shape_cast %97 : vector<1x16x16xf32> to vector<16x16xf32>
    %cst_65 = arith.constant dense<0.000000e+00> : vector<16xf32>
    %99 = vector.multi_reduction <add>, %98, %cst_65 [0] : vector<16x16xf32> to vector<16xf32>
    %100 = vector.shape_cast %99 : vector<16xf32> to vector<1x16xf32>
    %c0_66 = arith.constant 0 : index
    %c0_67 = arith.constant 0 : index
    %c0_68 = arith.constant 0 : index
    %c0_69 = arith.constant 0 : index
    %101 = vector.load %arg5[%c0_66, %c0_67, %c0_68, %c0_69] : memref<1x1x4x16xf32, #tpu.memory_space<vmem>>, vector<1x1x1x16xf32>
    %102 = vector.shape_cast %101 : vector<1x1x1x16xf32> to vector<1x16xf32>
    %103 = vector.shape_cast %100 : vector<1x16xf32> to vector<1x1x1x16xf32>
    tpu.vector_store %arg5[%c0_66, %c0_67, %c0_68, %c0_69], %103 {strides = array<i32>} : memref<1x1x4x16xf32, #tpu.memory_space<vmem>>, vector<1x1x1x16xf32>,
    %104 = vector.extract_strided_slice %96 {offsets = [1, 0, 0], sizes = [1, 16, 16], strides = [1, 1, 1]} : vector<4x16x16xf32> to vector<1x16x16xf32>
    %105 = vector.shape_cast %104 : vector<1x16x16xf32> to vector<16x16xf32>
    %cst_70 = arith.constant dense<0.000000e+00> : vector<16xf32>
    %106 = vector.multi_reduction <add>, %105, %cst_70 [0] : vector<16x16xf32> to vector<16xf32>
    %107 = vector.shape_cast %106 : vector<16xf32> to vector<1x16xf32>
    %c0_71 = arith.constant 0 : index
    %c0_72 = arith.constant 0 : index
    %c1 = arith.constant 1 : index
    %c0_73 = arith.constant 0 : index
    %108 = vector.load %arg5[%c0_71, %c0_72, %c1, %c0_73] : memref<1x1x4x16xf32, #tpu.memory_space<vmem>>, vector<1x1x1x16xf32>
    %109 = vector.shape_cast %108 : vector<1x1x1x16xf32> to vector<1x16xf32>
    %110 = vector.shape_cast %107 : vector<1x16xf32> to vector<1x1x1x16xf32>
    tpu.vector_store %arg5[%c0_71, %c0_72, %c1, %c0_73], %110 {strides = array<i32>} : memref<1x1x4x16xf32, #tpu.memory_space<vmem>>, vector<1x1x1x16xf32>,
    %111 = vector.extract_strided_slice %96 {offsets = [2, 0, 0], sizes = [1, 16, 16], strides = [1, 1, 1]} : vector<4x16x16xf32> to vector<1x16x16xf32>
    %112 = vector.shape_cast %111 : vector<1x16x16xf32> to vector<16x16xf32>
    %cst_74 = arith.constant dense<0.000000e+00> : vector<16xf32>
    %113 = vector.multi_reduction <add>, %112, %cst_74 [0] : vector<16x16xf32> to vector<16xf32>
    %114 = vector.shape_cast %113 : vector<16xf32> to vector<1x16xf32>
    %c0_75 = arith.constant 0 : index
    %c0_76 = arith.constant 0 : index
    %c2 = arith.constant 2 : index
    %c0_77 = arith.constant 0 : index
    %115 = vector.load %arg5[%c0_75, %c0_76, %c2, %c0_77] : memref<1x1x4x16xf32, #tpu.memory_space<vmem>>, vector<1x1x1x16xf32>
    %116 = vector.shape_cast %115 : vector<1x1x1x16xf32> to vector<1x16xf32>
    %117 = vector.shape_cast %114 : vector<1x16xf32> to vector<1x1x1x16xf32>
    tpu.vector_store %arg5[%c0_75, %c0_76, %c2, %c0_77], %117 {strides = array<i32>} : memref<1x1x4x16xf32, #tpu.memory_space<vmem>>, vector<1x1x1x16xf32>,
    %118 = vector.extract_strided_slice %96 {offsets = [3, 0, 0], sizes = [1, 16, 16], strides = [1, 1, 1]} : vector<4x16x16xf32> to vector<1x16x16xf32>
    %119 = vector.shape_cast %118 : vector<1x16x16xf32> to vector<16x16xf32>
    %cst_78 = arith.constant dense<0.000000e+00> : vector<16xf32>
    %120 = vector.multi_reduction <add>, %119, %cst_78 [0] : vector<16x16xf32> to vector<16xf32>
    %121 = vector.shape_cast %120 : vector<16xf32> to vector<1x16xf32>
    %c0_79 = arith.constant 0 : index
    %c0_80 = arith.constant 0 : index
    %c3_81 = arith.constant 3 : index
    %c0_82 = arith.constant 0 : index
    %122 = vector.load %arg5[%c0_79, %c0_80, %c3_81, %c0_82] : memref<1x1x4x16xf32, #tpu.memory_space<vmem>>, vector<1x1x1x16xf32>
    %123 = vector.shape_cast %122 : vector<1x1x1x16xf32> to vector<1x16xf32>
    %124 = vector.shape_cast %121 : vector<1x16xf32> to vector<1x1x1x16xf32>
    tpu.vector_store %arg5[%c0_79, %c0_80, %c3_81, %c0_82], %124 {strides = array<i32>} : memref<1x1x4x16xf32, #tpu.memory_space<vmem>>, vector<1x1x1x16xf32>,
    return
  }
  func.func @transform_0(%arg0: i32, %arg1: i32) -> (i32, i32) {
    %c0_i32 = arith.constant 0 : i32
    %c0_i32_0 = arith.constant 0 : i32
    %c0_i32_1 = arith.constant 0 : i32
    return %c0_i32, %c0_i32_0 : i32, i32
  }
  func.func @transform_1(%arg0: i32, %arg1: i32) -> (i32, i32, i32, i32) {
    %c0_i32 = arith.constant 0 : i32
    %c0_i32_0 = arith.constant 0 : i32
    %c0_i32_1 = arith.constant 0 : i32
    return %arg0, %arg1, %c0_i32, %c0_i32_0 : i32, i32, i32, i32
  }
  func.func @transform_2(%arg0: i32, %arg1: i32) -> (i32, i32, i32, i32) {
    %c0_i32 = arith.constant 0 : i32
    %c0_i32_0 = arith.constant 0 : i32
    %c0_i32_1 = arith.constant 0 : i32
    return %arg0, %arg1, %c0_i32, %c0_i32_0 : i32, i32, i32, i32
  }
  func.func @transform_3(%arg0: i32, %arg1: i32) -> (i32, i32, i32, i32) {
    %c0_i32 = arith.constant 0 : i32
    %c0_i32_0 = arith.constant 0 : i32
    %c0_i32_1 = arith.constant 0 : i32
    return %arg0, %arg1, %c0_i32, %c0_i32_0 : i32, i32, i32, i32
  }
}

</mosaic_0001>

<bundles_post_ra>
// kernel: tpu_custom_call.1
= control target key start
LH: loop header
LB: loop body
LE: loop exit
PB: predicated region body
PF: predicated region fallthrough
CT: control target
= control target key end

     0   :  { %8 = vsyncpa [#allocation5], 0  ;;  %s3208_s0 = inlined_call_operand.hbm [shape: f32[16,16], index: 0, kind: input, shape index: {}]   ;;  %s3209_s1 = inlined_call_operand.hbm [shape: f32[2,4,16,16], index: 1, kind: input, shape index: {}]   ;;  %s3210_s2 = inlined_call_operand.hbm [shape: f32[2,4,16,16], index: 2, kind: input, shape index: {}]   ;;  %s3211_s3 = inlined_call_operand.hbm [shape: f32[2,1,4,16], index: 3, kind: output, shape index: {}]  }
   0x1   :  { %9 = vsyncpa [#allocation8], 0 }
   0x2   :  { %11 = vsyncpa [#allocation8 + $0x1], 0 }
   0x3   :  { %12 = vsyncpa [#allocation6], 0 }
   0x4   :  { %14 = vsyncpa [#allocation6 + $0x1], 0  ;;  %s2307_s12 = smov 0   ;;  %s2309_s13 = smov 0  }
   0x5   :  { %s2311_s14 = smov 0   ;;  %s2313_s15 = smov 0  }
   0x6   :  { %s2315_s16 = smov 0   ;;  %s2317_s17 = smov 0  }
   0x7 LB: > { %s32_s18 = sadd.s32 1, %s2277_s16  ;;  %s62_s19 = sadd.s32 1, %s2269_s14  ;;  %s2281_s17 = sphi %s2317_s17, %s20_s17   ;;  %s2277_s16 = sphi %s2315_s16, %s3242_s16   ;;  %s2273_s15 = sphi %s2313_s15, %s3241_s15   ;;  %s2269_s14 = sphi %s2311_s14, %s3240_s14   ;;  %s2265_s13 = sphi %s2309_s13, %s3239_s13   ;;  %s2261_s12 = sphi %s2307_s12, %s3238_s12  }
   0x8   : > { %p34_p0 = scmp.ge.s32.totalorder %s32_s18, 2  ;;  %p69_p1 = scmp.ne.s32.totalorder %s2269_s14, %s2265_s13 }
   0x9   : > { %p70_p2 = scmp.eq.s32.totalorder %s2281_s17, 0  ;;  %p1952_p4 = scmp.ge.s32.totalorder %s2281_s17, 2 }
   0xa   : > { %s3244_s18 = smov (%p34_p0, %s32_s18), 0  ;;  %p2034_p6 = scmp.lt.s32.totalorder %s2281_s17, 2 }
   0xb   : > { %p2347_p3 = por %p70_p2, %p69_p1  ;;  %s57_s21 = ssub.s32 %s2277_s16, %s3244_s18 }
   0xc   : > { %p60_p5 = scmp.eq.s32.totalorder %s57_s21, 0  ;;  %s169_s22 = sand.u32 1, %s2281_s17  }
   0xd   : > { %s171_s23 = sand.u32 1, %s2269_s14   ;;  %s2000_s26 = sshll.u32 %s2277_s16, 6 }
   0xe   : > { %s2358_s24 = scalar_select %p60_p5, %s2269_s14, %s62_s19  }
   0xf   : > { %s1953_s25 = sshll.u32 %s171_s23, 6  ;;  %s181_s29 = scalar_lea.hbm %s3209_s1, %s2000_s26 }
  0x10   : > { %s173_s30 = scalar_lea.vmem [#allocation7], %s1953_s25  ;;  %s182_s5 = sshll.u32 %s181_s29, 4  ;;  %s183_s5 = int_to_ptr.hbm [resolvable:$true] %s182_s5 }
  0x11   : > { %s184_s4 = sshll.u32 %s173_s30, 4  ;;  %p2366_p7 = pnand %p2034_p6, %p2347_p3  ;;  %s185_s4 = int_to_ptr.vmem [resolvable:$true] %s184_s4 }
  0x12   : > { %s206_s9 = scalar_lea.hbm %s3210_s2, %s2000_s26  ;;  %s2373_s10 = scalar_lea.sflag [#allocation8], %s169_s22 }
  0x13   : > { %s2283_s11 = smov 128   ;;  %s2284_s19 = smov 8  }
  0x14   : > { %2025 = dma.hbm_to_vmem [thread:$0]  (!%p2366_p7), %s183_s5, 1024, %s185_s4, %s2373_s10, %s2283_s11, %s2283_s11, %s2284_s19  }
  0x15   : > { %s207_s20 = sshll.u32 %s206_s9, 4  ;;  %s198_s21 = scalar_lea.vmem [#allocation9], %s1953_s25  ;;  %s208_s20 = int_to_ptr.hbm [resolvable:$true] %s207_s20 }
  0x16   : > { %s209_s23 = sshll.u32 %s198_s21, 4  ;;  %s2382_s27 = sadd.s32 4294967295, %s2281_s17   ;;  %s210_s23 = int_to_ptr.vmem [resolvable:$true] %s209_s23 }
  0x17   : > { %s1949_s26 = sadd.s32 4294967294, %s2281_s17   ;;  %p75_p8 = scmp.ne.s32.totalorder %s2265_s13, %s2261_s12 }
  0x18   : > { %p76_p9 = scmp.eq.s32.totalorder %s2382_s27, 0  ;;  %p129_p10 = scmp.eq.s32.totalorder %s2382_s27, 1 }
  0x19   : > { %p135_p11 = scmp.eq.s32.totalorder %s1949_s26, 1  ;;  %p1950_p12 = scmp.ge.s32.totalorder %s2281_s17, 1 }
  0x1a   : > { %p2392_p13 = por %p76_p9, %p75_p8  ;;  %p2399_p0 = por %p129_p10, %p69_p1 }
  0x1b   : > { %p2403_p2 = por %p135_p11, %p75_p8  ;;  %p142_p3 = scmp.lt.s32.totalorder %s2281_s17, 3 }
  0x1c   : > { %s153_s4 = sshll.u32 %s3208_s0, 4  ;;  %s2285_s5 = smov [#allocation4]   ;;  %s154_s4 = int_to_ptr.hbm [resolvable:$true] %s153_s4 }
  0x1d   : > { %p143_p5 = pnand %p1950_p12, %p142_p3  ;;  %s155_s7 = sshll.u32 %s2285_s5, 4  ;;  %s156_s7 = int_to_ptr.vmem [resolvable:$true] %s155_s7 }
  0x1e   : > { %2028 = dma.hbm_to_vmem [thread:$0]  (!%p2366_p7), %s208_s20, 1024, %s210_s23, %s2373_s10, %s2283_s11, %s2283_s11, %s2284_s19  }
  0x1f   : > { %p2018_p6 = pneg %p143_p5  ;;  %221 = sbr.rel (%p143_p5) target bundleno = 426 (0x1aa), region = 32 }
  0x21   : > { %p2019_p1 = pnand %p2018_p6, %p76_p9 }
  0x23   : > { %2021 = dma.hbm_to_vmem [thread:$0]  (!%p2019_p1), %s154_s4, 256, %s156_s7, [#allocation5], %s2283_s11, %s2283_s11, %s2284_s19  }
  0x24   : > { %2248 = dma.done.wait (%p76_p9), [#allocation5], 256  }
  0x25   : > { %2250 = vsyncadd (%p76_p9), [#allocation5], 4294967040  ;;  %s228_s8 = sand.u32 1, %s2382_s27   ;;  %s2428_s6 = sand.u32 1, %s2265_s13  }
  0x26   : > { %s1961_s9 = sshll.u32 %s2428_s6, 6  ;;  %s229_s10 = scalar_lea.sflag [#allocation8], %s228_s8 }
  0x27   : > { %s2431_s20 = scalar_lea.vmem [#allocation7], %s1961_s9 }
  0x28   : > { %2252 = dma.done.wait (%p2392_p13), %s229_s10, 2048  }
  0x29   : > { %2254 = vsyncadd (%p2392_p13), %s229_s10, 4294965248  ;;  %vm289_vm0 = vcmask 130048   ;;  %v387_v0 = vld [vmem:[#allocation4 + $0x8] sm:$0xff]  ;;  %v386_v1 = vld [vmem:[#allocation4] sm:$0xff]  ;;  %s2439_s11 = scalar_lea.vmem [#allocation9], %s1961_s9  ;;  %s1963_s19 = sshll.u32 %s2428_s6, 2 }
  0x2a   : > { %v273_v2 = vld [vmem:[%s2431_s20] sm:$0xff]  ;;  %498 = vmatpush.msra.mxu0 %v387_v0  ;;  %2002 = vmatpush.msra.mxu1 %v387_v0  ;;  %v274_v5 = vld [vmem:[%s2431_s20 + $0x8] sm:$0xff]  ;;  %v275_v10 = vld [vmem:[%s2431_s20 + $0x10] sm:$0xff]  ;;  %s1997_s21 = sshll.u32 %s2273_s15, 2  ;;  %vm1782_vm1 = vcmask 122880   ;;  %s270_s22 = scalar_lea.vmem [#allocation10], %s1963_s19 }
  0x2b   : > { %290 = vst.msk [vmem:[#allocation2] sm:$0xff] %vm289_vm0, %v273_v2  ;;  %v306_v3 = vmul.f32 %v273_v2, %v273_v2  ;;  %v281_v4 = vld [vmem:[%s2439_s11] sm:$0xff]  ;;  %v282_v6 = vld [vmem:[%s2439_s11 + $0x8] sm:$0xff]  ;;  %2004 = vmatpush.msra.mxu3 %v387_v0  ;;  %2003 = vmatpush.msra.mxu2 %v387_v0  ;;  %v307_v9 = vmul.f32 %v274_v5, %v274_v5  ;;  %v283_v11 = vld [vmem:[%s2439_s11 + $0x10] sm:$0xff]  ;;  %s1826_s26 = scalar_lea.hbm %s3211_s3, %s1997_s21  ;;  %s1828_s15 = sshll.u32 %s270_s22, 4  ;;  %s1829_s15 = int_to_ptr.vmem [resolvable:$true] %s1828_s15 }
  0x2c   : > { %298 = vst.msk [vmem:[#allocation2 + $0x40] sm:$0xff] %vm289_vm0, %v281_v4  ;;  %v314_v7 = vmul.f32 %v281_v4, %v281_v4  ;;  %v338_v8 = vmul.f32 %v281_v4, %v273_v2  ;;  %499 = vmatpush.msra.mxu0 %v386_v1  ;;  %2005 = vmatpush.msra.mxu1 %v386_v1  ;;  %v276_v18 = vld [vmem:[%s2431_s20 + $0x18] sm:$0xff]  ;;  %v277_v26 = vld [vmem:[%s2431_s20 + $0x20] sm:$0xff]  ;;  %v278_v34 = vld [vmem:[%s2431_s20 + $0x28] sm:$0xff]  ;;  %s1830_s29 = sshll.u32 %s1826_s26, 4  ;;  %s1815_s30 = scalar_lea.sflag [#allocation6], %s2428_s6  ;;  %s1831_s29 = int_to_ptr.hbm [resolvable:$true] %s1830_s29 }
  0x2d   : > { %291 = vst.msk [vmem:[#allocation2 + $0x8] sm:$0xff] %vm289_vm0, %v274_v5  ;;  %v315_v12 = vmul.f32 %v282_v6, %v282_v6  ;;  %v339_v13 = vmul.f32 %v282_v6, %v274_v5  ;;  %2007 = vmatpush.msra.mxu3 %v386_v1  ;;  %2006 = vmatpush.msra.mxu2 %v386_v1  ;;  %v284_v19 = vld [vmem:[%s2439_s11 + $0x18] sm:$0xff]  ;;  %v285_v27 = vld [vmem:[%s2439_s11 + $0x20] sm:$0xff]  ;;  %v286_v35 = vld [vmem:[%s2439_s11 + $0x28] sm:$0xff]  ;;  %s2209_s4 = sshra.s32 %s1831_s29, 4  ;;  %s2215_s9 = scalar_lea.hbm %s3211_s3, 8  ;;  %s2210_s4 = int_to_ptr.hbm [resolvable:$true] %s2209_s4 }
  0x2e   : > { %346 = vst.msk [vmem:[#allocation2 + $0xc0] sm:$0xff] %vm289_vm0, %v338_v8  ;;  %v322_v14 = vadd.f32 %v314_v7, %v306_v3  ;;  %v308_v15 = vmul.f32 %v275_v10, %v275_v10  ;;  %v316_v16 = vmul.f32 %v283_v11, %v283_v11  ;;  %v340_v20 = vmul.f32 %v283_v11, %v275_v10  ;;  %v279_v43 = vld [vmem:[%s2431_s20 + $0x30] sm:$0xff]  ;;  %v280_v55 = vld [vmem:[%s2431_s20 + $0x38] sm:$0xff]  ;;  %s2211_s5 = scalar_lea.hbm %s2210_s4, 4  ;;  %p2216_p10 = scmp.lt.s32.totalorder %s2210_s4, %s3211_s3 }
  0x2f   : > { %299 = vst.msk [vmem:[#allocation2 + $0x48] sm:$0xff] %vm289_vm0, %v282_v6  ;;  %v323_v17 = vadd.f32 %v315_v12, %v307_v9  ;;  %v309_v23 = vmul.f32 %v276_v18, %v276_v18  ;;  %v317_v24 = vmul.f32 %v284_v19, %v284_v19  ;;  %v341_v29 = vmul.f32 %v284_v19, %v276_v18  ;;  %v287_v44 = vld [vmem:[%s2439_s11 + $0x30] sm:$0xff]  ;;  %v288_v56 = vld [vmem:[%s2439_s11 + $0x38] sm:$0xff]  ;;  %p2212_p7 = scmp.ne.s32.totalorder %s2210_s4, %s2211_s5  ;;  %p2217_p11 = scmp.lt.s32.totalorder %s2215_s9, %s2211_s5 }
  0x30   : > { %330 = vst.msk [vmem:[#allocation2 + $0x80] sm:$0xff] %vm289_vm0, %v322_v14  ;;  %v324_v22 = vadd.f32 %v316_v16, %v308_v15  ;;  %v310_v31 = vmul.f32 %v277_v26, %v277_v26  ;;  %v318_v32 = vmul.f32 %v285_v27, %v285_v27  ;;  %v342_v38 = vmul.f32 %v285_v27, %v277_v26 }
  0x31   : > { %347 = vst.msk [vmem:[#allocation2 + $0xc8] sm:$0xff] %vm289_vm0, %v339_v13  ;;  %v325_v30 = vadd.f32 %v317_v24, %v309_v23  ;;  %v311_v40 = vmul.f32 %v278_v34, %v278_v34  ;;  %v319_v41 = vmul.f32 %v286_v35, %v286_v35  ;;  %v343_v46 = vmul.f32 %v286_v35, %v278_v34  ;;  %p2213_p8 = pnand %p2212_p7, %p2399_p0  ;;  %p2218_p12 = por %p2217_p11, %p2216_p10 }
  0x32   : > { %v354_v21 = vld [vmem:[#allocation2] sm:$0xff]  ;;  %331 = vst.msk [vmem:[#allocation2 + $0x88] sm:$0xff] %vm289_vm0, %v323_v17  ;;  %v326_v39 = vadd.f32 %v318_v32, %v310_v31  ;;  %v312_v48 = vmul.f32 %v279_v43, %v279_v43  ;;  %v320_v49 = vmul.f32 %v287_v44, %v287_v44  ;;  %v344_v52 = vmul.f32 %v287_v44, %v279_v43 }
  0x33   : > { %1964 = vmatmul.msk.f32.vlgmr.msra.gmra.mxu0 %vm289_vm0, %v354_v21  ;;  %v362_v25 = vld [vmem:[#allocation2 + $0x40] sm:$0xff]  ;;  %292 = vst.msk [vmem:[#allocation2 + $0x10] sm:$0xff] %vm289_vm0, %v275_v10  ;;  %v327_v47 = vadd.f32 %v319_v41, %v311_v40  ;;  %v313_v57 = vmul.f32 %v280_v55, %v280_v55  ;;  %v321_v58 = vmul.f32 %v288_v56, %v288_v56  ;;  %p2214_p9 = pneg %p2213_p8 }
  0x34   : > { %1972 = vmatmul.msk.f32.vlgmr.msra.gmra.mxu1 %vm289_vm0, %v362_v25  ;;  %300 = vst.msk [vmem:[#allocation2 + $0x50] sm:$0xff] %vm289_vm0, %v283_v11  ;;  %v355_v36 = vld [vmem:[#allocation2 + $0x8] sm:$0xff]  ;;  %v328_v53 = vadd.f32 %v320_v49, %v312_v48  ;;  %v345_v60 = vmul.f32 %v288_v56, %v280_v55 }
  0x35   : > { %v378_v28 = vld [vmem:[#allocation2 + $0xc0] sm:$0xff]  ;;  %348 = vst.msk [vmem:[#allocation2 + $0xd0] sm:$0xff] %vm289_vm0, %v340_v20  ;;  %v329_v61 = vadd.f32 %v321_v58, %v313_v57  ;;  %p2219_p13 = pnand %p2218_p12, %p2214_p9 }
  0x36   : > { %1988 = vmatmul.msk.f32.vlgmr.msra.gmra.mxu3 %vm289_vm0, %v378_v28  ;;  %332 = vst.msk [vmem:[#allocation2 + $0x90] sm:$0xff] %vm289_vm0, %v324_v22  ;;  %v363_v37 = vld [vmem:[#allocation2 + $0x48] sm:$0xff] }
  0x37   : > { %v370_v33 = vld [vmem:[#allocation2 + $0x80] sm:$0xff]  ;;  %293 = vst.msk [vmem:[#allocation2 + $0x18] sm:$0xff] %vm289_vm0, %v276_v18  ;;  %v2286_v18 = vmov 0.0  }
  0x38   : > { %1980 = vmatmul.msk.f32.vlgmr.msra.gmra.mxu2 %vm289_vm0, %v370_v33  ;;  %301 = vst.msk [vmem:[#allocation2 + $0x58] sm:$0xff] %vm289_vm0, %v284_v19  ;;  %v379_v42 = vld [vmem:[#allocation2 + $0xc8] sm:$0xff] }
  0x39   : > { %349 = vst.msk [vmem:[#allocation2 + $0xd8] sm:$0xff] %vm289_vm0, %v341_v29  ;;  %v371_v45 = vld [vmem:[#allocation2 + $0x88] sm:$0xff] }
  0x3a   : > { %333 = vst.msk [vmem:[#allocation2 + $0x98] sm:$0xff] %vm289_vm0, %v325_v30  ;;  %v356_v50 = vld [vmem:[#allocation2 + $0x10] sm:$0xff] }
  0x3b   : > { %1965 = vmatmul.msk.f32.gmra.mxu0 %vm289_vm0, %v355_v36  ;;  %294 = vst.msk [vmem:[#allocation2 + $0x20] sm:$0xff] %vm289_vm0, %v277_v26  ;;  %v364_v51 = vld [vmem:[#allocation2 + $0x50] sm:$0xff] }
  0x3c   : > { %1973 = vmatmul.msk.f32.gmra.mxu1 %vm289_vm0, %v363_v37  ;;  %302 = vst.msk [vmem:[#allocation2 + $0x60] sm:$0xff] %vm289_vm0, %v285_v27  ;;  %v380_v54 = vld [vmem:[#allocation2 + $0xd0] sm:$0xff] }
  0x3d   : > { %350 = vst.msk [vmem:[#allocation2 + $0xe0] sm:$0xff] %vm289_vm0, %v342_v38  ;;  %v372_v59 = vld [vmem:[#allocation2 + $0x90] sm:$0xff] }
  0x3e   : > { %1989 = vmatmul.msk.f32.gmra.mxu3 %vm289_vm0, %v379_v42  ;;  %334 = vst.msk [vmem:[#allocation2 + $0xa0] sm:$0xff] %vm289_vm0, %v326_v39  ;;  %v357_v62 = vld [vmem:[#allocation2 + $0x18] sm:$0xff] }
  0x3f   : > { %295 = vst.msk [vmem:[#allocation2 + $0x28] sm:$0xff] %vm289_vm0, %v278_v34  ;;  %v365_v63 = vld [vmem:[#allocation2 + $0x58] sm:$0xff] }
  0x40   : > { %1981 = vmatmul.msk.f32.gmra.mxu2 %vm289_vm0, %v371_v45  ;;  %303 = vst.msk [vmem:[#allocation2 + $0x68] sm:$0xff] %vm289_vm0, %v286_v35  ;;  %v381_v0 = vld [vmem:[#allocation2 + $0xd8] sm:$0xff] }
  0x41   : > { %351 = vst.msk [vmem:[#allocation2 + $0xe8] sm:$0xff] %vm289_vm0, %v343_v46  ;;  %v373_v1 = vld [vmem:[#allocation2 + $0x98] sm:$0xff] }
  0x42   : > { %335 = vst.msk [vmem:[#allocation2 + $0xa8] sm:$0xff] %vm289_vm0, %v327_v47  ;;  %v358_v2 = vld [vmem:[#allocation2 + $0x20] sm:$0xff] }
  0x43   : > { %1966 = vmatmul.msk.f32.gmra.mxu0 %vm289_vm0, %v356_v50  ;;  %296 = vst.msk [vmem:[#allocation2 + $0x30] sm:$0xff] %vm289_vm0, %v279_v43  ;;  %v366_v3 = vld [vmem:[#allocation2 + $0x60] sm:$0xff] }
  0x44   : > { %1974 = vmatmul.msk.f32.gmra.mxu1 %vm289_vm0, %v364_v51  ;;  %304 = vst.msk [vmem:[#allocation2 + $0x70] sm:$0xff] %vm289_vm0, %v287_v44  ;;  %v382_v4 = vld [vmem:[#allocation2 + $0xe0] sm:$0xff] }
  0x45   : > { %352 = vst.msk [vmem:[#allocation2 + $0xf0] sm:$0xff] %vm289_vm0, %v344_v52  ;;  %v374_v5 = vld [vmem:[#allocation2 + $0xa0] sm:$0xff] }
  0x46   : > { %1990 = vmatmul.msk.f32.gmra.mxu3 %vm289_vm0, %v380_v54  ;;  %336 = vst.msk [vmem:[#allocation2 + $0xb0] sm:$0xff] %vm289_vm0, %v328_v53  ;;  %v359_v6 = vld [vmem:[#allocation2 + $0x28] sm:$0xff] }
  0x47   : > { %297 = vst.msk [vmem:[#allocation2 + $0x38] sm:$0xff] %vm289_vm0, %v280_v55  ;;  %v367_v7 = vld [vmem:[#allocation2 + $0x68] sm:$0xff] }
  0x48   : > { %1982 = vmatmul.msk.f32.gmra.mxu2 %vm289_vm0, %v372_v59  ;;  %305 = vst.msk [vmem:[#allocation2 + $0x78] sm:$0xff] %vm289_vm0, %v288_v56  ;;  %v383_v8 = vld [vmem:[#allocation2 + $0xe8] sm:$0xff] }
  0x49   : > { %353 = vst.msk [vmem:[#allocation2 + $0xf8] sm:$0xff] %vm289_vm0, %v345_v60  ;;  %v375_v9 = vld [vmem:[#allocation2 + $0xa8] sm:$0xff] }
  0x4a   : > { %337 = vst.msk [vmem:[#allocation2 + $0xb8] sm:$0xff] %vm289_vm0, %v329_v61  ;;  %v360_v10 = vld [vmem:[#allocation2 + $0x30] sm:$0xff] }
  0x4b   : > { %1967 = vmatmul.msk.f32.gmra.mxu0 %vm289_vm0, %v357_v62  ;;  %v368_v11 = vld [vmem:[#allocation2 + $0x70] sm:$0xff]  ;;  %597 = vst.msk [vmem:[#allocation3] sm:$0xff] %vm289_vm0, %v2286_v18 }
  0x4c   : > { %1975 = vmatmul.msk.f32.gmra.mxu1 %vm289_vm0, %v365_v63  ;;  %v384_v12 = vld [vmem:[#allocation2 + $0xf0] sm:$0xff]  ;;  %598 = vst.msk [vmem:[#allocation3 + $0x20] sm:$0xff] %vm289_vm0, %v2286_v18 }
  0x4d   : > { %v376_v13 = vld [vmem:[#allocation2 + $0xb0] sm:$0xff]  ;;  %599 = vst.msk [vmem:[#allocation3 + $0x40] sm:$0xff] %vm289_vm0, %v2286_v18 }
  0x4e   : > { %1991 = vmatmul.msk.f32.gmra.mxu3 %vm289_vm0, %v381_v0  ;;  %v361_v14 = vld [vmem:[#allocation2 + $0x38] sm:$0xff]  ;;  %600 = vst.msk [vmem:[#allocation3 + $0x60] sm:$0xff] %vm289_vm0, %v2286_v18 }
  0x4f   : > { %v369_v15 = vld [vmem:[#allocation2 + $0x78] sm:$0xff]  ;;  %601 = vst.msk [vmem:[#allocation3 + $0x80] sm:$0xff] %vm289_vm0, %v2286_v18 }
  0x50   : > { %1983 = vmatmul.msk.f32.gmra.mxu2 %vm289_vm0, %v373_v1  ;;  %v385_v16 = vld [vmem:[#allocation2 + $0xf8] sm:$0xff]  ;;  %602 = vst.msk [vmem:[#allocation3 + $0xa0] sm:$0xff] %vm289_vm0, %v2286_v18 }
  0x51   : > { %v377_v17 = vld [vmem:[#allocation2 + $0xb8] sm:$0xff]  ;;  %603 = vst.msk [vmem:[#allocation3 + $0xc0] sm:$0xff] %vm289_vm0, %v2286_v18 }
  0x52   : > { %604 = vst.msk [vmem:[#allocation3 + $0xe0] sm:$0xff] %vm289_vm0, %v2286_v18 }
  0x53   : > { %1968 = vmatmul.msk.f32.gmra.mxu0 %vm289_vm0, %v358_v2  ;;  %605 = vst.msk [vmem:[#allocation3 + $0x100] sm:$0xff] %vm289_vm0, %v2286_v18 }
  0x54   : > { %1976 = vmatmul.msk.f32.gmra.mxu1 %vm289_vm0, %v366_v3  ;;  %606 = vst.msk [vmem:[#allocation3 + $0x120] sm:$0xff] %vm289_vm0, %v2286_v18 }
  0x55   : > { %607 = vst.msk [vmem:[#allocation3 + $0x140] sm:$0xff] %vm289_vm0, %v2286_v18 }
  0x56   : > { %1992 = vmatmul.msk.f32.gmra.mxu3 %vm289_vm0, %v382_v4  ;;  %608 = vst.msk [vmem:[#allocation3 + $0x160] sm:$0xff] %vm289_vm0, %v2286_v18 }
  0x57   : > { %609 = vst.msk [vmem:[#allocation3 + $0x180] sm:$0xff] %vm289_vm0, %v2286_v18 }
  0x58   : > { %1984 = vmatmul.msk.f32.gmra.mxu2 %vm289_vm0, %v374_v5  ;;  %610 = vst.msk [vmem:[#allocation3 + $0x1a0] sm:$0xff] %vm289_vm0, %v2286_v18 }
  0x59   : > { %611 = vst.msk [vmem:[#allocation3 + $0x1c0] sm:$0xff] %vm289_vm0, %v2286_v18 }
  0x5a   : > { %612 = vst.msk [vmem:[#allocation3 + $0x1e0] sm:$0xff] %vm289_vm0, %v2286_v18 }
  0x5b   : > { %1969 = vmatmul.msk.f32.gmra.mxu0 %vm289_vm0, %v359_v6  ;;  %613 = vst.msk [vmem:[#allocation3 + $0x18] sm:$0xff] %vm289_vm0, %v2286_v18 }
  0x5c   : > { %1977 = vmatmul.msk.f32.gmra.mxu1 %vm289_vm0, %v367_v7  ;;  %614 = vst.msk [vmem:[#allocation3 + $0x38] sm:$0xff] %vm289_vm0, %v2286_v18 }
  0x5d   : > { %615 = vst.msk [vmem:[#allocation3 + $0x58] sm:$0xff] %vm289_vm0, %v2286_v18 }
  0x5e   : > { %1993 = vmatmul.msk.f32.gmra.mxu3 %vm289_vm0, %v383_v8  ;;  %616 = vst.msk [vmem:[#allocation3 + $0x78] sm:$0xff] %vm289_vm0, %v2286_v18 }
  0x5f   : > { %617 = vst.msk [vmem:[#allocation3 + $0x98] sm:$0xff] %vm289_vm0, %v2286_v18 }
  0x60   : > { %1985 = vmatmul.msk.f32.gmra.mxu2 %vm289_vm0, %v375_v9  ;;  %618 = vst.msk [vmem:[#allocation3 + $0xb8] sm:$0xff] %vm289_vm0, %v2286_v18 }
  0x61   : > { %619 = vst.msk [vmem:[#allocation3 + $0xd8] sm:$0xff] %vm289_vm0, %v2286_v18 }
  0x62   : > { %620 = vst.msk [vmem:[#allocation3 + $0xf8] sm:$0xff] %vm289_vm0, %v2286_v18 }
  0x63   : > { %1970 = vmatmul.msk.f32.gmra.mxu0 %vm289_vm0, %v360_v10  ;;  %621 = vst.msk [vmem:[#allocation3 + $0x118] sm:$0xff] %vm289_vm0, %v2286_v18 }
  0x64   : > { %1978 = vmatmul.msk.f32.gmra.mxu1 %vm289_vm0, %v368_v11  ;;  %622 = vst.msk [vmem:[#allocation3 + $0x138] sm:$0xff] %vm289_vm0, %v2286_v18 }
  0x65   : > { %623 = vst.msk [vmem:[#allocation3 + $0x158] sm:$0xff] %vm289_vm0, %v2286_v18 }
  0x66   : > { %1994 = vmatmul.msk.f32.gmra.mxu3 %vm289_vm0, %v384_v12  ;;  %624 = vst.msk [vmem:[#allocation3 + $0x178] sm:$0xff] %vm289_vm0, %v2286_v18 }
  0x67   : > { %625 = vst.msk [vmem:[#allocation3 + $0x198] sm:$0xff] %vm289_vm0, %v2286_v18 }
  0x68   : > { %1986 = vmatmul.msk.f32.gmra.mxu2 %vm289_vm0, %v376_v13  ;;  %626 = vst.msk [vmem:[#allocation3 + $0x1b8] sm:$0xff] %vm289_vm0, %v2286_v18 }
  0x69   : > { %627 = vst.msk [vmem:[#allocation3 + $0x1d8] sm:$0xff] %vm289_vm0, %v2286_v18 }
  0x6a   : > { %628 = vst.msk [vmem:[#allocation3 + $0x1f8] sm:$0xff] %vm289_vm0, %v2286_v18 }
  0x6b   : > { %1971 = vmatmul.msk.f32.gmra.mxu0 %vm289_vm0, %v361_v14 }
  0x6c   : > { %1979 = vmatmul.msk.f32.gmra.mxu1 %vm289_vm0, %v369_v15 }
  0x6e   : > { %1995 = vmatmul.msk.f32.gmra.mxu3 %vm289_vm0, %v385_v16 }
  0x70   : > { %1987 = vmatmul.msk.f32.gmra.mxu2 %vm289_vm0, %v377_v17 }
  0xb0   : > { %v501_v19 = vpop.f32.mrf.mxu0 }
  0xb1   : > { %629 = vst.msk [vmem:[#allocation3 + $0x8] sm:$0xff] %vm289_vm0, %v501_v19  ;;  %v525_v20 = vpop.f32.mrf.mxu1 }
  0xb2   : > { %637 = vst.msk [vmem:[#allocation3 + $0x88] sm:$0xff] %vm289_vm0, %v525_v20 }
  0xb8   : > { %v661_v21 = vld [vmem:[#allocation3 + $0x3] sm:$0xff]  ;;  %v504_v23 = vpop.f32.mrf.mxu0 }
  0xb9   : > { %v725_v22 = vld [vmem:[#allocation3 + $0x4] sm:$0xff]  ;;  %v528_v24 = vpop.f32.mrf.mxu1  ;;  %v573_v25 = vpop.f32.mrf.mxu3  ;;  %v693_v26 = vmul.f32 0.0010283801, %v661_v21  ;;  %630 = vst.msk [vmem:[#allocation3 + $0x10] sm:$0xff] %vm289_vm0, %v504_v23 }
  0xba   : > { %v757_v27 = vmul.f32 0.007598758, %v725_v22  ;;  %v821_v28 = vld [vmem:[#allocation3 + $0x5] sm:$0xff]  ;;  %638 = vst.msk [vmem:[#allocation3 + $0x90] sm:$0xff] %vm289_vm0, %v528_v24 }
  0xbb   : > { %v549_v29 = vpop.f32.mrf.mxu2  ;;  %v669_v30 = vld [vmem:[#allocation3 + $0x83] sm:$0xff]  ;;  %v853_v36 = vmul.f32 0.036000773, %v821_v28  ;;  %653 = vst.msk [vmem:[#allocation3 + $0x188] sm:$0xff] %vm289_vm0, %v573_v25 }
  0xbc   : > { %v733_v31 = vld [vmem:[#allocation3 + $0x84] sm:$0xff]  ;;  %v701_v33 = vmul.f32 0.0010283801, %v669_v30  ;;  %v789_v35 = vadd.f32 %v757_v27, %v693_v26  ;;  %645 = vst.msk [vmem:[#allocation3 + $0x108] sm:$0xff] %vm289_vm0, %v549_v29 }
  0xbd   : > { %v829_v32 = vld [vmem:[#allocation3 + $0x85] sm:$0xff]  ;;  %v765_v34 = vmul.f32 0.007598758, %v733_v31 }
  0xbe   : > { %v917_v37 = vld [vmem:[#allocation3 + $0x6] sm:$0xff]  ;;  %v861_v39 = vmul.f32 0.036000773, %v829_v32  ;;  %v885_v46 = vadd.f32 %v853_v36, %v789_v35 }
  0xbf   : > { %v797_v38 = vadd.f32 %v765_v34, %v701_v33  ;;  %v925_v40 = vld [vmem:[#allocation3 + $0x86] sm:$0xff]  ;;  %v949_v47 = vmul.f32 0.10936069, %v917_v37 }
  0xc0   : > { %v507_v41 = vpop.f32.mrf.mxu0  ;;  %v662_v42 = vld [vmem:[#allocation3 + $0xb] sm:$0xff]  ;;  %v957_v53 = vmul.f32 0.10936069, %v925_v40  ;;  %v1397_v36 = vld [vmem:[#allocation3 + $0x13] sm:$0xff] }
  0xc1   : > { %v726_v43 = vld [vmem:[#allocation3 + $0xc] sm:$0xff]  ;;  %631 = vst.msk [vmem:[#allocation3 + $0x28] sm:$0xff] %vm289_vm0, %v507_v41  ;;  %v531_v45 = vpop.f32.mrf.mxu1  ;;  %v694_v48 = vmul.f32 0.0010283801, %v662_v42  ;;  %v576_v50 = vpop.f32.mrf.mxu3  ;;  %v893_v52 = vadd.f32 %v861_v39, %v797_v38  ;;  %v981_v60 = vadd.f32 %v949_v47, %v885_v46  ;;  %v1413_v27 = vmul.f32 0.036000773, %v662_v42 }
  0xc2   : > { %v2557_v44 = vld [vmem:[#allocation3 + $0xd] sm:$0xff]  ;;  %v2560_v49 = vmul.f32 0.007598758, %v726_v43  ;;  %639 = vst.msk [vmem:[#allocation3 + $0xa8] sm:$0xff] %vm289_vm0, %v531_v45  ;;  %v1541_v39 = vld [vmem:[#allocation3 + $0x15] sm:$0xff] }
  0xc3   : > { %v1013_v51 = vld [vmem:[#allocation3 + $0x7] sm:$0xff]  ;;  %v854_v57 = vmul.f32 0.036000773, %v2557_v44  ;;  %v1014_v58 = vld [vmem:[#allocation3 + $0xf] sm:$0xff]  ;;  %654 = vst.msk [vmem:[#allocation3 + $0x190] sm:$0xff] %vm289_vm0, %v576_v50  ;;  %v552_v59 = vpop.f32.mrf.mxu2  ;;  %v989_v0 = vadd.f32 %v957_v53, %v893_v52 }
  0xc4   : > { %v918_v54 = vld [vmem:[#allocation3 + $0xe] sm:$0xff]  ;;  %v790_v56 = vadd.f32 %v2560_v49, %v694_v48  ;;  %v1045_v61 = vmul.f32 0.21300554, %v1013_v51  ;;  %v1046_v4 = vmul.f32 0.21300554, %v1014_v58  ;;  %646 = vst.msk [vmem:[#allocation3 + $0x110] sm:$0xff] %vm289_vm0, %v552_v59 }
  0xc5   : > { %v1021_v55 = vld [vmem:[#allocation3 + $0x87] sm:$0xff]  ;;  %v950_v63 = vmul.f32 0.10936069, %v918_v54  ;;  %v1110_v6 = vld [vmem:[#allocation3 + $0x10] sm:$0xff]  ;;  %v2573_v40 = vmul.f32 0.0010283801, %v2557_v44 }
  0xc6   : > { %v886_v62 = vadd.f32 %v854_v57, %v790_v56  ;;  %v1053_v1 = vmul.f32 0.21300554, %v1021_v55  ;;  %v1109_v2 = vld [vmem:[#allocation3 + $0x8] sm:$0xff]  ;;  %v1077_v8 = vadd.f32 %v1045_v61, %v981_v60  ;;  %v1142_v17 = vmul.f32 0.26601171, %v1110_v6  ;;  %v1206_v21 = vld [vmem:[#allocation3 + $0x11] sm:$0xff] }
  0xc7   : > { %v670_v5 = vld [vmem:[#allocation3 + $0x8b] sm:$0xff]  ;;  %v1141_v13 = vmul.f32 0.26601171, %v1109_v2  ;;  %v1238_v35 = vmul.f32 0.21300554, %v1206_v21  ;;  %v1477_v37 = vld [vmem:[#allocation3 + $0x14] sm:$0xff] }
  0xc8   : > { %v982_v3 = vadd.f32 %v950_v63, %v886_v62  ;;  %v702_v7 = vmul.f32 0.0010283801, %v670_v5  ;;  %v1117_v9 = vld [vmem:[#allocation3 + $0x88] sm:$0xff]  ;;  %v1085_v14 = vadd.f32 %v1053_v1, %v989_v0  ;;  %v510_v16 = vpop.f32.mrf.mxu0  ;;  %v1302_v32 = vld [vmem:[#allocation3 + $0x12] sm:$0xff]  ;;  %v1414_v50 = vmul.f32 0.036000773, %v1397_v36 }
  0xc9   : > { %v734_v11 = vld [vmem:[#allocation3 + $0x8c] sm:$0xff]  ;;  %632 = vst.msk [vmem:[#allocation3 + $0x30] sm:$0xff] %vm289_vm0, %v510_v16  ;;  %v1149_v20 = vmul.f32 0.26601171, %v1117_v9  ;;  %v534_v24 = vpop.f32.mrf.mxu1  ;;  %v1173_v25 = vadd.f32 %v1141_v13, %v1077_v8  ;;  %v1334_v47 = vmul.f32 0.10936069, %v1302_v32  ;;  %v579_v62 = vpop.f32.mrf.mxu3 }
  0xca   : > { %v1078_v10 = vadd.f32 %v1046_v4, %v982_v3  ;;  %v830_v12 = vld [vmem:[#allocation3 + $0x8d] sm:$0xff]  ;;  %v2567_v15 = vmul.f32 0.007598758, %v734_v11  ;;  %640 = vst.msk [vmem:[#allocation3 + $0xb0] sm:$0xff] %vm289_vm0, %v534_v24  ;;  %v1493_v51 = vmul.f32 0.007598758, %v1477_v37 }
  0xcb   : > { %v1205_v18 = vld [vmem:[#allocation3 + $0x9] sm:$0xff]  ;;  %v862_v23 = vmul.f32 0.036000773, %v830_v12  ;;  %v1181_v29 = vadd.f32 %v1149_v20, %v1085_v14  ;;  %v2575_v54 = vmul.f32 0.0010283801, %v1541_v39  ;;  %v1214_v1 = vld [vmem:[#allocation3 + $0x91] sm:$0xff]  ;;  %v555_v21 = vpop.f32.mrf.mxu2 }
  0xcc   : > { %v926_v19 = vld [vmem:[#allocation3 + $0x8e] sm:$0xff]  ;;  %v798_v22 = vadd.f32 %v2567_v15, %v702_v7  ;;  %v1174_v26 = vadd.f32 %v1142_v17, %v1078_v10  ;;  %v1237_v30 = vmul.f32 0.21300554, %v1205_v18  ;;  %v1421_v56 = vmul.f32 0.036000773, %v670_v5  ;;  %v677_v57 = vld [vmem:[#allocation3 + $0x103] sm:$0xff] }
  0xcd   : > { %v1213_v28 = vld [vmem:[#allocation3 + $0x89] sm:$0xff]  ;;  %v958_v34 = vmul.f32 0.10936069, %v926_v19  ;;  %v709_v2 = vmul.f32 0.0010283801, %v677_v57  ;;  %v1310_v7 = vld [vmem:[#allocation3 + $0x92] sm:$0xff] }
  0xce   : > { %v1301_v31 = vld [vmem:[#allocation3 + $0xa] sm:$0xff]  ;;  %v894_v33 = vadd.f32 %v862_v23, %v798_v22  ;;  %v1245_v43 = vmul.f32 0.21300554, %v1213_v28  ;;  %v1269_v42 = vadd.f32 %v1237_v30, %v1173_v25  ;;  %v1270_v45 = vadd.f32 %v1238_v35, %v1174_v26  ;;  %v1401_v9 = vld [vmem:[#allocation3 + $0x93] sm:$0xff]  ;;  %655 = vst.msk [vmem:[#allocation3 + $0x1a8] sm:$0xff] %vm289_vm0, %v579_v62 }
  0xcf   : > { %v1022_v38 = vld [vmem:[#allocation3 + $0x8f] sm:$0xff]  ;;  %v1333_v46 = vmul.f32 0.10936069, %v1301_v31  ;;  %v685_v44 = vld [vmem:[#allocation3 + $0x183] sm:$0xff]  ;;  %v1565_v10 = vmul.f32 0.0010283801, %v830_v12 }
  0xd0   : > { %v990_v41 = vadd.f32 %v958_v34, %v894_v33  ;;  %v1309_v48 = vld [vmem:[#allocation3 + $0x8a] sm:$0xff]  ;;  %v1054_v52 = vmul.f32 0.21300554, %v1022_v38  ;;  %v1277_v53 = vadd.f32 %v1245_v43, %v1181_v29  ;;  %v1366_v0 = vadd.f32 %v1334_v47, %v1270_v45  ;;  %v1481_v11 = vld [vmem:[#allocation3 + $0x94] sm:$0xff]  ;;  %647 = vst.msk [vmem:[#allocation3 + $0x128] sm:$0xff] %vm289_vm0, %v555_v21 }
  0xd1   : > { %v1118_v55 = vld [vmem:[#allocation3 + $0x90] sm:$0xff]  ;;  %v1341_v59 = vmul.f32 0.10936069, %v1309_v48  ;;  %v749_v60 = vld [vmem:[#allocation3 + $0x184] sm:$0xff]  ;;  %v1365_v63 = vadd.f32 %v1333_v46, %v1269_v42  ;;  %v717_v5 = vmul.f32 0.0010283801, %v685_v44 }
  0xd2   : > { %v1086_v58 = vadd.f32 %v1054_v52, %v990_v41  ;;  %v741_v61 = vld [vmem:[#allocation3 + $0x104] sm:$0xff]  ;;  %v1150_v6 = vmul.f32 0.26601171, %v1118_v55  ;;  %v781_v13 = vmul.f32 0.007598758, %v749_v60  ;;  %v1545_v18 = vld [vmem:[#allocation3 + $0x95] sm:$0xff]  ;;  %v1446_v23 = vadd.f32 %v1414_v50, %v1366_v0 }
  0xd3   : > { %v773_v3 = vmul.f32 0.007598758, %v741_v61  ;;  %v837_v4 = vld [vmem:[#allocation3 + $0x105] sm:$0xff]  ;;  %v1373_v8 = vadd.f32 %v1341_v59, %v1277_v53  ;;  %v1246_v17 = vmul.f32 0.21300554, %v1214_v1  ;;  %v1445_v22 = vadd.f32 %v1413_v27, %v1365_v63 }
  0xd4   : > { %v1182_v16 = vadd.f32 %v1150_v6, %v1086_v58  ;;  %v845_v19 = vld [vmem:[#allocation3 + $0x185] sm:$0xff]  ;;  %v869_v20 = vmul.f32 0.036000773, %v837_v4  ;;  %v1342_v24 = vmul.f32 0.10936069, %v1310_v7  ;;  %v813_v34 = vadd.f32 %v781_v13, %v717_v5 }
  0xd5   : > { %v805_v14 = vadd.f32 %v773_v3, %v709_v2  ;;  %v941_v25 = vld [vmem:[#allocation3 + $0x186] sm:$0xff]  ;;  %v1422_v12 = vmul.f32 0.036000773, %v1401_v9  ;;  %v1453_v28 = vadd.f32 %v1421_v56, %v1373_v8  ;;  %v2579_v29 = vmul.f32 0.007598758, %v1481_v11 }
  0xd6   : > { %v933_v26 = vld [vmem:[#allocation3 + $0x106] sm:$0xff]  ;;  %v2581_v33 = vmul.f32 0.0010283801, %v1545_v18  ;;  %v877_v35 = vmul.f32 0.036000773, %v845_v19  ;;  %v1278_v27 = vadd.f32 %v1246_v17, %v1182_v16  ;;  %v1509_v42 = vadd.f32 %v1445_v22, %v2560_v49 }
  0xd7   : > { %v1037_v30 = vld [vmem:[#allocation3 + $0x187] sm:$0xff]  ;;  %v901_v32 = vadd.f32 %v869_v20, %v805_v14  ;;  %v973_v38 = vmul.f32 0.10936069, %v941_v25  ;;  %v965_v39 = vmul.f32 0.10936069, %v933_v26  ;;  %v1510_v45 = vadd.f32 %v1493_v51, %v1446_v23 }
  0xd8   : > { %v1133_v31 = vld [vmem:[#allocation3 + $0x188] sm:$0xff]  ;;  %v1069_v46 = vmul.f32 0.21300554, %v1037_v30  ;;  %v1517_v52 = vadd.f32 %v1453_v28, %v2567_v15  ;;  %v909_v59 = vadd.f32 %v877_v35, %v813_v34  ;;  %v1374_v63 = vadd.f32 %v1342_v24, %v1278_v27  ;;  %v1134_v34 = vld [vmem:[#allocation3 + $0x190] sm:$0xff] }
  0xd9   : > { %v1029_v36 = vld [vmem:[#allocation3 + $0x107] sm:$0xff]  ;;  %v2584_v47 = vmul.f32 0.26601171, %v1133_v31  ;;  %v997_v53 = vadd.f32 %v965_v39, %v901_v32  ;;  %v2590_v2 = vadd.f32 %v2573_v40, %v1509_v42  ;;  %v2593_v15 = vadd.f32 %v2575_v54, %v1510_v45  ;;  %v513_v45 = vpop.f32.mrf.mxu0 }
  0xda   : > { %v1125_v37 = vld [vmem:[#allocation3 + $0x108] sm:$0xff]  ;;  %v1061_v55 = vmul.f32 0.21300554, %v1029_v36  ;;  %v2599_v8 = vadd.f32 %v1565_v10, %v1517_v52  ;;  %v1005_v16 = vadd.f32 %v973_v38, %v909_v59  ;;  %v1454_v20 = vadd.f32 %v1422_v12, %v1374_v63  ;;  %633 = vst.msk [vmem:[#allocation3 + $0x48] sm:$0xff] %vm289_vm0, %v513_v45 }
  0xdb   : > { %v663_v41 = vld [vmem:[#allocation3 + $0x23] sm:$0xff]  ;;  %v1157_v56 = vmul.f32 0.26601171, %v1125_v37  ;;  %v2601_v13 = vld [vmem:[#allocation3 + $0x18b] sm:$0xff]  ;;  %v2613_v24 = vmul.f32 %v2590_v2, %v2590_v2  ;;  %v2617_v25 = vmul.f32 %v2593_v15, %v2593_v15  ;;  %v2637_v59 = vmul.f32 0.26601171, %v1134_v34  ;;  %v582_v34 = vpop.f32.mrf.mxu3 }
  0xdc   : > { %v727_v43 = vld [vmem:[#allocation3 + $0x24] sm:$0xff]  ;;  %v695_v44 = vmul.f32 0.0010283801, %v663_v41  ;;  %v1093_v9 = vadd.f32 %v1061_v55, %v997_v53  ;;  %v750_v14 = vld [vmem:[#allocation3 + $0x18c] sm:$0xff]  ;;  %v718_v26 = vmul.f32 0.0010283801, %v2601_v13  ;;  %v2626_v31 = vmul.f32 %v2599_v8, %v2599_v8 }
  0xdd   : > { %v823_v48 = vld [vmem:[#allocation3 + $0x25] sm:$0xff]  ;;  %v759_v60 = vmul.f32 0.007598758, %v727_v43  ;;  %v2609_v10 = vld [vmem:[#allocation3 + $0x18d] sm:$0xff]  ;;  %v2620_v28 = vmul.f32 0.007598758, %v750_v14  ;;  %v1101_v27 = vadd.f32 %v1069_v46, %v1005_v16 }
  0xde   : > { %v919_v50 = vld [vmem:[#allocation3 + $0x26] sm:$0xff]  ;;  %v855_v49 = vmul.f32 0.036000773, %v823_v48  ;;  %v942_v23 = vld [vmem:[#allocation3 + $0x18e] sm:$0xff]  ;;  %v1189_v32 = vadd.f32 %v1157_v56, %v1093_v9  ;;  %v878_v39 = vmul.f32 0.036000773, %v2609_v10  ;;  %v1518_v48 = vadd.f32 %v2579_v29, %v1454_v20 }
  0xdf   : > { %v1015_v57 = vld [vmem:[#allocation3 + $0x27] sm:$0xff]  ;;  %v2587_v51 = vmul.f32 0.10936069, %v919_v50  ;;  %v791_v40 = vadd.f32 %v759_v60, %v695_v44  ;;  %v1038_v12 = vld [vmem:[#allocation3 + $0x18f] sm:$0xff]  ;;  %v974_v41 = vmul.f32 0.10936069, %v942_v23 }
  0xe0   : > { %v1111_v58 = vld [vmem:[#allocation3 + $0x28] sm:$0xff]  ;;  %v2595_v3 = vmul.f32 0.21300554, %v1015_v57  ;;  %v1230_v50 = vld [vmem:[#allocation3 + $0x191] sm:$0xff]  ;;  %v2635_v46 = vmul.f32 0.21300554, %v1038_v12 }
  0xe1   : > { %v671_v61 = vld [vmem:[#allocation3 + $0xa3] sm:$0xff]  ;;  %v2597_v4 = vmul.f32 0.26601171, %v1111_v58  ;;  %v678_v54 = vld [vmem:[#allocation3 + $0x10b] sm:$0xff]  ;;  %v887_v38 = vadd.f32 %v855_v49, %v791_v40  ;;  %v814_v58 = vadd.f32 %v2620_v28, %v718_v26  ;;  %v2648_v9 = vmul.f32 0.21300554, %v1230_v50 }
  0xe2   : > { %v735_v62 = vld [vmem:[#allocation3 + $0xa4] sm:$0xff]  ;;  %v703_v11 = vmul.f32 0.0010283801, %v671_v61  ;;  %v742_v19 = vld [vmem:[#allocation3 + $0x10c] sm:$0xff]  ;;  %v710_v35 = vmul.f32 0.0010283801, %v678_v54  ;;  %v537_v61 = vpop.f32.mrf.mxu1 }
  0xe3   : > { %v831_v0 = vld [vmem:[#allocation3 + $0xa5] sm:$0xff]  ;;  %v767_v5 = vmul.f32 0.007598758, %v735_v62  ;;  %v2622_v30 = vld [vmem:[#allocation3 + $0x10d] sm:$0xff]  ;;  %v2628_v36 = vmul.f32 0.007598758, %v742_v19  ;;  %v910_v26 = vadd.f32 %v878_v39, %v814_v58 }
  0xe4   : > { %v927_v1 = vld [vmem:[#allocation3 + $0xa6] sm:$0xff]  ;;  %v863_v17 = vmul.f32 0.036000773, %v831_v0  ;;  %v934_v42 = vld [vmem:[#allocation3 + $0x10e] sm:$0xff]  ;;  %v870_v53 = vmul.f32 0.036000773, %v2622_v30 }
  0xe5   : > { %v1023_v6 = vld [vmem:[#allocation3 + $0xa7] sm:$0xff]  ;;  %v2603_v18 = vmul.f32 0.10936069, %v927_v1  ;;  %v806_v52 = vadd.f32 %v2628_v36, %v710_v35  ;;  %v799_v57 = vadd.f32 %v767_v5, %v703_v11  ;;  %v1030_v60 = vld [vmem:[#allocation3 + $0x10f] sm:$0xff]  ;;  %v966_v63 = vmul.f32 0.10936069, %v934_v42 }
  0xe6   : > { %v1119_v7 = vld [vmem:[#allocation3 + $0xa8] sm:$0xff]  ;;  %v2605_v21 = vmul.f32 0.21300554, %v1023_v6  ;;  %v2643_v1 = vadd.f32 %v2584_v47, %v1101_v27  ;;  %v983_v6 = vadd.f32 %v2587_v51, %v887_v38  ;;  %v1326_v11 = vld [vmem:[#allocation3 + $0x192] sm:$0xff]  ;;  %v1062_v16 = vmul.f32 0.21300554, %v1030_v60 }
  0xe7   : > { %v2607_v22 = vmul.f32 0.26601171, %v1119_v7  ;;  %v1221_v37 = vld [vmem:[#allocation3 + $0x109] sm:$0xff]  ;;  %v902_v62 = vadd.f32 %v870_v53, %v806_v52  ;;  %v1429_v19 = vmul.f32 0.036000773, %v678_v54  ;;  %641 = vst.msk [vmem:[#allocation3 + $0xc8] sm:$0xff] %vm289_vm0, %v537_v61  ;;  %v895_v23 = vadd.f32 %v863_v17, %v799_v57  ;;  %v558_v52 = vpop.f32.mrf.mxu2 }
  0xe8   : > { %v1229_v43 = vld [vmem:[#allocation3 + $0x189] sm:$0xff]  ;;  %v1253_v55 = vmul.f32 0.21300554, %v1221_v37  ;;  %v1222_v47 = vld [vmem:[#allocation3 + $0x111] sm:$0xff]  ;;  %v2659_v54 = vadd.f32 %v2581_v33, %v1518_v48  ;;  %v1079_v17 = vadd.f32 %v2595_v3, %v983_v6  ;;  %v2662_v39 = vmul.f32 0.10936069, %v1326_v11 }
  0xe9   : > { %v1317_v56 = vld [vmem:[#allocation3 + $0x10a] sm:$0xff]  ;;  %v2646_v7 = vmul.f32 0.21300554, %v1229_v43  ;;  %v998_v14 = vadd.f32 %v966_v63, %v902_v62  ;;  %v1409_v35 = vld [vmem:[#allocation3 + $0x193] sm:$0xff]  ;;  %v2665_v45 = vmul.f32 0.036000773, %v2601_v13  ;;  %v991_v33 = vadd.f32 %v2603_v18, %v895_v23 }
  0xea   : > { %v1325_v44 = vld [vmem:[#allocation3 + $0x18a] sm:$0xff]  ;;  %v1285_v29 = vadd.f32 %v1253_v55, %v1189_v32  ;;  %v1349_v49 = vmul.f32 0.10936069, %v1317_v56  ;;  %v1318_v38 = vld [vmem:[#allocation3 + $0x112] sm:$0xff]  ;;  %v1254_v56 = vmul.f32 0.21300554, %v1222_v47  ;;  %v1006_v48 = vadd.f32 %v974_v41, %v910_v26 }
  0xeb   : > { %v2639_v0 = vld [vmem:[#allocation3 + $0x2b] sm:$0xff]  ;;  %v2651_v12 = vmul.f32 0.10936069, %v1325_v44  ;;  %v1094_v37 = vadd.f32 %v1062_v16, %v998_v14  ;;  %v1489_v53 = vld [vmem:[#allocation3 + $0x194] sm:$0xff]  ;;  %656 = vst.msk [vmem:[#allocation3 + $0x1b0] sm:$0xff] %vm289_vm0, %v582_v34  ;;  %v2679_v6 = vmul.f32 %v2659_v54, %v2659_v54  ;;  %v1175_v18 = vadd.f32 %v2597_v4, %v1079_v17 }
  0xec   : > { %v1126_v5 = vld [vmem:[#allocation3 + $0x110] sm:$0xff]  ;;  %v1381_v40 = vadd.f32 %v1349_v49, %v1285_v29  ;;  %v696_v51 = vmul.f32 0.0010283801, %v2639_v0  ;;  %v2671_v3 = vmul.f32 0.036000773, %v1409_v35  ;;  %648 = vst.msk [vmem:[#allocation3 + $0x130] sm:$0xff] %vm289_vm0, %v558_v52  ;;  %v1087_v26 = vadd.f32 %v2605_v21, %v991_v33 }
  0xed   : > { %v728_v20 = vld [vmem:[#allocation3 + $0x2c] sm:$0xff]  ;;  %v1158_v27 = vmul.f32 0.26601171, %v1126_v5  ;;  %v1350_v44 = vmul.f32 0.10936069, %v1318_v38  ;;  %v1553_v11 = vld [vmem:[#allocation3 + $0x195] sm:$0xff]  ;;  %v1102_v47 = vadd.f32 %v2635_v46, %v1006_v48 }
  0xee   : > { %v2654_v32 = vld [vmem:[#allocation3 + $0x2d] sm:$0xff]  ;;  %v1461_v43 = vadd.f32 %v1429_v19, %v1381_v40  ;;  %v2656_v42 = vmul.f32 0.007598758, %v728_v20  ;;  %v2682_v41 = vmul.f32 0.007598758, %v1489_v53  ;;  %v1549_v40 = vld [vmem:[#allocation3 + $0x115] sm:$0xff] }
  0xef   : > { %v920_v50 = vld [vmem:[#allocation3 + $0x2e] sm:$0xff]  ;;  %v1190_v55 = vadd.f32 %v1158_v27, %v1094_v37  ;;  %v856_v58 = vmul.f32 0.036000773, %v2654_v32  ;;  %v2685_v5 = vmul.f32 0.0010283801, %v2609_v10 }
  0xf0   : > { %v792_v57 = vadd.f32 %v2656_v42, %v696_v51  ;;  %v1405_v60 = vld [vmem:[#allocation3 + $0x113] sm:$0xff]  ;;  %v1525_v61 = vadd.f32 %v1461_v43, %v2628_v36  ;;  %v952_v63 = vmul.f32 0.10936069, %v920_v50  ;;  %v2674_v49 = vld [vmem:[#allocation3 + $0xab] sm:$0xff]  ;;  %v1573_v19 = vmul.f32 0.0010283801, %v2622_v30 }
  0xf1   : > { %v1286_v13 = vadd.f32 %v1254_v56, %v1190_v55  ;;  %v1016_v29 = vld [vmem:[#allocation3 + $0x2f] sm:$0xff]  ;;  %v1430_v16 = vmul.f32 0.036000773, %v1405_v60  ;;  %v704_v35 = vmul.f32 0.0010283801, %v2674_v49  ;;  %v1293_v30 = vadd.f32 %v2646_v7, %v2643_v1  ;;  %v516_v55 = vpop.f32.mrf.mxu0 }
  0xf2   : > { %v888_v62 = vadd.f32 %v856_v58, %v792_v57  ;;  %v1485_v36 = vld [vmem:[#allocation3 + $0x114] sm:$0xff]  ;;  %v736_v23 = vld [vmem:[#allocation3 + $0xac] sm:$0xff]  ;;  %v1048_v51 = vmul.f32 0.21300554, %v1016_v29  ;;  %v2691_v37 = vmul.f32 0.0010283801, %v1553_v11  ;;  %v1605_v38 = vadd.f32 %v1573_v19, %v1525_v61 }
  0xf3   : > { %v1382_v14 = vadd.f32 %v1350_v44, %v1286_v13  ;;  %v1112_v4 = vld [vmem:[#allocation3 + $0x30] sm:$0xff]  ;;  %v1501_v27 = vmul.f32 0.007598758, %v1485_v36  ;;  %v1574_v50 = vmul.f32 0.0010283801, %v1549_v40  ;;  %v2701_v57 = vadd.f32 %v2626_v31, %v2613_v24  ;;  %634 = vst.msk [vmem:[#allocation3 + $0x50] sm:$0xff] %vm289_vm0, %v516_v55  ;;  %v540_v44 = vpop.f32.mrf.mxu1 }
  0xf4   : > { %v984_v20 = vadd.f32 %v952_v63, %v888_v62  ;;  %v1207_v34 = vld [vmem:[#allocation3 + $0x29] sm:$0xff]  ;;  %v1208_v43 = vld [vmem:[#allocation3 + $0x31] sm:$0xff]  ;;  %v2697_v53 = vmul.f32 0.007598758, %v736_v23  ;;  %v1144_v58 = vmul.f32 0.26601171, %v1112_v4  ;;  %v1198_v1 = vadd.f32 %v2637_v59, %v1102_v47 }
  0xf5   : > { %v1462_v10 = vadd.f32 %v1430_v16, %v1382_v14  ;;  %v2693_v17 = vld [vmem:[#allocation3 + $0xad] sm:$0xff]  ;;  %3221 = vst [vmem:[#allocation14_spill] sm:$0xff] %v2701_v57  ;;  %v1239_v33 = vmul.f32 0.21300554, %v1207_v34  ;;  %v1240_v7 = vmul.f32 0.21300554, %v1208_v43  ;;  %v1653_v63 = vsub.f32 %v1605_v38, %v2701_v57 }
  0xf6   : > { %v1080_v21 = vadd.f32 %v1048_v51, %v984_v20  ;;  %v1303_v52 = vld [vmem:[#allocation3 + $0x2a] sm:$0xff]  ;;  %v1304_v46 = vld [vmem:[#allocation3 + $0x32] sm:$0xff]  ;;  %v800_v61 = vadd.f32 %v2697_v53, %v704_v35  ;;  %v864_v62 = vmul.f32 0.036000773, %v2693_v17  ;;  %642 = vst.msk [vmem:[#allocation3 + $0xd0] sm:$0xff] %vm289_vm0, %v540_v44  ;;  %v1183_v19 = vadd.f32 %v2607_v22, %v1087_v26 }
  0xf7   : > { %v1526_v56 = vadd.f32 %v1501_v27, %v1462_v10  ;;  %v928_v48 = vld [vmem:[#allocation3 + $0xae] sm:$0xff]  ;;  %v1271_v29 = vadd.f32 %v1239_v33, %v1175_v18  ;;  %v1335_v24 = vmul.f32 0.10936069, %v1303_v52  ;;  %v1336_v31 = vmul.f32 0.10936069, %v1304_v46  ;;  %v743_v55 = vld [vmem:[#allocation3 + $0x124] sm:$0xff] }
  0xf8   : > { %v1398_v60 = vld [vmem:[#allocation3 + $0x33] sm:$0xff]  ;;  %v1176_v36 = vadd.f32 %v1144_v58, %v1080_v21  ;;  %v1415_v14 = vmul.f32 0.036000773, %v2639_v0  ;;  %v896_v59 = vadd.f32 %v864_v62, %v800_v61  ;;  %v960_v40 = vmul.f32 0.10936069, %v928_v48  ;;  %v1215_v18 = vld [vmem:[#allocation3 + $0xa9] sm:$0xff]  ;;  %v585_v61 = vpop.f32.mrf.mxu3 }
  0xf9   : > { %v1478_v13 = vld [vmem:[#allocation3 + $0x34] sm:$0xff]  ;;  %v1606_v20 = vadd.f32 %v1574_v50, %v1526_v56  ;;  %v2711_v23 = vmul.f32 0.036000773, %v1398_v60  ;;  %v1294_v4 = vadd.f32 %v2648_v9, %v1198_v1  ;;  %v2717_v34 = vmul.f32 0.0010283801, %v2654_v32  ;;  %v1311_v27 = vld [vmem:[#allocation3 + $0xaa] sm:$0xff] }
  0xfa   : > { %v1024_v11 = vld [vmem:[#allocation3 + $0xaf] sm:$0xff]  ;;  %v2713_v47 = vmul.f32 0.007598758, %v1478_v13  ;;  %v992_v35 = vadd.f32 %v960_v40, %v896_v59  ;;  %v2721_v38 = vadd.f32 %v2679_v6, %v2617_v25  ;;  %v2723_v22 = vadd.f32 0.0009, %v1653_v63  ;;  %v679_v21 = vld [vmem:[#allocation3 + $0x123] sm:$0xff] }
  0xfb   : > { %v1542_v16 = vld [vmem:[#allocation3 + $0x35] sm:$0xff]  ;;  %v1056_v10 = vmul.f32 0.21300554, %v1024_v11  ;;  %v1367_v26 = vadd.f32 %v1335_v24, %v1271_v29  ;;  %v1272_v52 = vadd.f32 %v1240_v7, %v1176_v36  ;;  %v1247_v32 = vmul.f32 0.21300554, %v1215_v18  ;;  %v687_v29 = vld [vmem:[#allocation3 + $0x1a3] sm:$0xff]  ;;  %v561_v18 = vpop.f32.mrf.mxu2 }
  0xfc   : > { %v1120_v51 = vld [vmem:[#allocation3 + $0xb0] sm:$0xff]  ;;  %3222 = vst [vmem:[#allocation15_spill] sm:$0xff] %v2721_v38  ;;  %v2725_v43 = vmul.f32 0.0010283801, %v1542_v16  ;;  %v1654_v56 = vsub.f32 %v1606_v20, %v2721_v38  ;;  %v1343_v33 = vmul.f32 0.10936069, %v1311_v27  ;;  %v1389_v25 = vadd.f32 %v2651_v12, %v1293_v30 }
  0xfd   : > { %v1216_v0 = vld [vmem:[#allocation3 + $0xb1] sm:$0xff]  ;;  %3223 = vst [vmem:[#allocation16_spill] sm:$0xff] %v2723_v22  ;;  %v1088_v9 = vadd.f32 %v1056_v10, %v992_v35  ;;  %v1152_v46 = vmul.f32 0.26601171, %v1120_v51  ;;  %v1423_v1 = vmul.f32 0.036000773, %v2674_v49  ;;  %v2732_v7 = vmul.f32 %v2599_v8, %v2590_v2 }
  0xfe   : > { %v1312_v50 = vld [vmem:[#allocation3 + $0xb2] sm:$0xff]  ;;  %v1248_v58 = vmul.f32 0.21300554, %v1216_v0  ;;  %v711_v13 = vmul.f32 0.0010283801, %v679_v21  ;;  %v1390_v62 = vadd.f32 %v2662_v39, %v1294_v4  ;;  %v751_v24 = vld [vmem:[#allocation3 + $0x1a4] sm:$0xff]  ;;  %v1368_v16 = vadd.f32 %v1336_v31, %v1272_v52 }
  0xff   : > { %v1402_v48 = vld [vmem:[#allocation3 + $0xb3] sm:$0xff]  ;;  %v1344_v6 = vmul.f32 0.10936069, %v1312_v50  ;;  %v1184_v63 = vadd.f32 %v1152_v46, %v1088_v9  ;;  %v847_v11 = vld [vmem:[#allocation3 + $0x1a5] sm:$0xff]  ;;  %v775_v36 = vmul.f32 0.007598758, %v743_v55  ;;  %v1447_v59 = vadd.f32 %v1415_v14, %v1367_v26 }
 0x100   : > { %v1482_v44 = vld [vmem:[#allocation3 + $0xb4] sm:$0xff]  ;;  %v1279_v12 = vadd.f32 %v1247_v32, %v1183_v19  ;;  %v2735_v30 = vmul.f32 0.036000773, %v1402_v48  ;;  %v943_v49 = vld [vmem:[#allocation3 + $0x1a6] sm:$0xff]  ;;  %657 = vst.msk [vmem:[#allocation3 + $0x1c8] sm:$0xff] %vm289_vm0, %v585_v61  ;;  %v2747_v31 = vmul.f32 %v2659_v54, %v2593_v15  ;;  %v1469_v14 = vadd.f32 %v2665_v45, %v1389_v25 }
 0x101   : > { %v1546_v60 = vld [vmem:[#allocation3 + $0xb5] sm:$0xff]  ;;  %v1039_v40 = vld [vmem:[#allocation3 + $0x1a7] sm:$0xff]  ;;  %v2738_v51 = vadd.f32 0.0009, %v1654_v56  ;;  %v2740_v2 = vmul.f32 0.007598758, %v1482_v44  ;;  %v807_v39 = vadd.f32 %v775_v36, %v711_v13  ;;  %v1470_v10 = vadd.f32 %v2671_v3, %v1390_v62 }
 0x102   : > { %v839_v20 = vld [vmem:[#allocation3 + $0x125] sm:$0xff]  ;;  %v2743_v8 = vmul.f32 0.0010283801, %v2693_v17  ;;  %v719_v19 = vmul.f32 0.0010283801, %v687_v29  ;;  %649 = vst.msk [vmem:[#allocation3 + $0x148] sm:$0xff] %vm289_vm0, %v561_v18  ;;  %v1280_v0 = vadd.f32 %v1248_v58, %v1184_v63  ;;  %v1448_v21 = vadd.f32 %v2711_v23, %v1368_v16 }
 0x103   : > { %3224 = vst [vmem:[#allocation17_spill] sm:$0xff] %v2738_v51  ;;  %v783_v4 = vmul.f32 0.007598758, %v751_v24  ;;  %v1135_v35 = vld [vmem:[#allocation3 + $0x1a8] sm:$0xff]  ;;  %v2752_v27 = vmul.f32 0.0010283801, %v1546_v60  ;;  %v1375_v52 = vadd.f32 %v1343_v33, %v1279_v12  ;;  %v1511_v46 = vadd.f32 %v1447_v59, %v2656_v42 }
 0x104   : > { %v871_v17 = vmul.f32 0.036000773, %v839_v20  ;;  %v935_v26 = vld [vmem:[#allocation3 + $0x126] sm:$0xff]  ;;  %v879_v15 = vmul.f32 0.036000773, %v847_v11  ;;  %v1533_v48 = vadd.f32 %v1469_v14, %v2620_v28  ;;  %v1534_v13 = vadd.f32 %v2682_v41, %v1470_v10 }
 0x105   : > { %v1031_v50 = vld [vmem:[#allocation3 + $0x127] sm:$0xff]  ;;  %v975_v54 = vmul.f32 0.10936069, %v943_v49  ;;  %v2756_v32 = vmul.f32 0.21300554, %v1039_v40  ;;  %v815_v44 = vadd.f32 %v783_v4, %v719_v19  ;;  %v1376_v61 = vadd.f32 %v1344_v6, %v1280_v0 }
 0x106   : > { %v1127_v9 = vld [vmem:[#allocation3 + $0x128] sm:$0xff]  ;;  %v2758_v55 = vmul.f32 0.26601171, %v1135_v35  ;;  %v903_v3 = vadd.f32 %v871_v17, %v807_v39  ;;  %v967_v25 = vmul.f32 0.10936069, %v935_v26  ;;  %v1512_v24 = vadd.f32 %v2713_v47, %v1448_v21 }
 0x107   : > { %v665_v45 = vld [vmem:[#allocation3 + $0x43] sm:$0xff]  ;;  %v1063_v60 = vmul.f32 0.21300554, %v1031_v50  ;;  %v1159_v62 = vmul.f32 0.26601171, %v1127_v9  ;;  %v1455_v11 = vadd.f32 %v1423_v1, %v1375_v52  ;;  %v2763_v59 = vld [vmem:[#allocation3 + $0x1ab] sm:$0xff]  ;;  %v2766_v12 = vadd.f32 %v2717_v34, %v1511_v46 }
 0x108   : > { %v729_v56 = vld [vmem:[#allocation3 + $0x44] sm:$0xff]  ;;  %v697_v63 = vmul.f32 0.0010283801, %v665_v45  ;;  %v752_v28 = vld [vmem:[#allocation3 + $0x1ac] sm:$0xff]  ;;  %v999_v49 = vadd.f32 %v967_v25, %v903_v3  ;;  %v2773_v39 = vadd.f32 %v2685_v5, %v1533_v48  ;;  %v911_v47 = vadd.f32 %v879_v15, %v815_v44 }
 0x109   : > { %v825_v58 = vld [vmem:[#allocation3 + $0x45] sm:$0xff]  ;;  %v761_v36 = vmul.f32 0.007598758, %v729_v56  ;;  %v2776_v19 = vadd.f32 %v2691_v37, %v1534_v13  ;;  %v1456_v34 = vadd.f32 %v2735_v30, %v1376_v61  ;;  %v720_v10 = vmul.f32 0.0010283801, %v2763_v59  ;;  %v2788_v21 = vld [vmem:[#allocation3 + $0x1ad] sm:$0xff]  ;;  %v519_v13 = vpop.f32.mrf.mxu0 }
 0x10a   : > { %v921_v23 = vld [vmem:[#allocation3 + $0x46] sm:$0xff]  ;;  %v857_v16 = vmul.f32 0.036000773, %v825_v58  ;;  %v2780_v0 = vmul.f32 0.007598758, %v752_v28  ;;  %v2783_v17 = vadd.f32 %v2725_v43, %v1512_v24  ;;  %v1519_v5 = vadd.f32 %v1455_v11, %v2697_v53  ;;  %v944_v9 = vld [vmem:[#allocation3 + $0x1ae] sm:$0xff] }
 0x10b   : > { %v1017_v33 = vld [vmem:[#allocation3 + $0x47] sm:$0xff]  ;;  %v2768_v40 = vmul.f32 0.10936069, %v921_v23  ;;  %v2792_v37 = vmul.f32 %v2766_v12, %v2766_v12  ;;  %v1095_v30 = vadd.f32 %v1063_v60, %v999_v49  ;;  %v793_v52 = vadd.f32 %v761_v36, %v697_v63  ;;  %v1040_v58 = vld [vmem:[#allocation3 + $0x1af] sm:$0xff]  ;;  %635 = vst.msk [vmem:[#allocation3 + $0x68] sm:$0xff] %vm289_vm0, %v519_v13 }
 0x10c   : > { %v673_v42 = vld [vmem:[#allocation3 + $0xc3] sm:$0xff]  ;;  %v2770_v41 = vmul.f32 0.21300554, %v1017_v33  ;;  %v2794_v45 = vld [vmem:[#allocation3 + $0x12b] sm:$0xff]  ;;  %v1007_v43 = vadd.f32 %v975_v54, %v911_v47  ;;  %v1520_v44 = vadd.f32 %v2740_v2, %v1456_v34  ;;  %v816_v25 = vadd.f32 %v2780_v0, %v720_v10 }
 0x10d   : > { %v737_v29 = vld [vmem:[#allocation3 + $0xc4] sm:$0xff]  ;;  %v705_v1 = vmul.f32 0.0010283801, %v673_v42  ;;  %v744_v46 = vld [vmem:[#allocation3 + $0x12c] sm:$0xff]  ;;  %v880_v60 = vmul.f32 0.036000773, %v2788_v21  ;;  %v2808_v54 = vmul.f32 %v2783_v17, %v2783_v17  ;;  %v2811_v61 = vadd.f32 %v2743_v8, %v1519_v5  ;;  %v588_v5 = vpop.f32.mrf.mxu3 }
 0x10e   : > { %v1113_v6 = vld [vmem:[#allocation3 + $0x48] sm:$0xff]  ;;  %v769_v18 = vmul.f32 0.007598758, %v737_v29  ;;  %v1136_v48 = vld [vmem:[#allocation3 + $0x1b0] sm:$0xff]  ;;  %v712_v23 = vmul.f32 0.0010283801, %v2794_v45  ;;  %v1191_v2 = vadd.f32 %v1159_v62, %v1095_v30  ;;  %v889_v24 = vadd.f32 %v857_v16, %v793_v52 }
 0x10f   : > { %v833_v20 = vld [vmem:[#allocation3 + $0xc5] sm:$0xff]  ;;  %v2786_v26 = vmul.f32 0.26601171, %v1113_v6  ;;  %v2804_v33 = vld [vmem:[#allocation3 + $0x12d] sm:$0xff]  ;;  %v976_v63 = vmul.f32 0.10936069, %v944_v9  ;;  %v543_v6 = vpop.f32.mrf.mxu1  ;;  %v2822_v62 = vadd.f32 %v2752_v27, %v1520_v44  ;;  %v912_v16 = vadd.f32 %v880_v60, %v816_v25 }
 0x110   : > { %v929_v14 = vld [vmem:[#allocation3 + $0xc6] sm:$0xff]  ;;  %v865_v50 = vmul.f32 0.036000773, %v833_v20  ;;  %v801_v3 = vadd.f32 %v769_v18, %v705_v1  ;;  %v2813_v29 = vmul.f32 0.007598758, %v744_v46  ;;  %v1232_v28 = vld [vmem:[#allocation3 + $0x1b1] sm:$0xff]  ;;  %v1103_v20 = vadd.f32 %v2756_v32, %v1007_v43 }
 0x111   : > { %v1025_v4 = vld [vmem:[#allocation3 + $0xc7] sm:$0xff]  ;;  %v961_v15 = vmul.f32 0.10936069, %v929_v14  ;;  %v1072_v11 = vmul.f32 0.21300554, %v1040_v58  ;;  %v1032_v14 = vld [vmem:[#allocation3 + $0x12f] sm:$0xff]  ;;  %v2826_v32 = vmul.f32 %v2811_v61, %v2811_v61  ;;  %v985_v27 = vadd.f32 %v2768_v40, %v889_v24 }
 0x112   : > { %v1121_v35 = vld [vmem:[#allocation3 + $0xc8] sm:$0xff]  ;;  %v2796_v56 = vmul.f32 0.21300554, %v1025_v4  ;;  %v2815_v36 = vmul.f32 0.26601171, %v1136_v48  ;;  %v897_v47 = vadd.f32 %v865_v50, %v801_v3  ;;  %v808_v18 = vadd.f32 %v2813_v29, %v712_v23  ;;  %643 = vst.msk [vmem:[#allocation3 + $0xe8] sm:$0xff] %vm289_vm0, %v543_v6 }
 0x113   : > { %v2798_v53 = vmul.f32 0.26601171, %v1121_v35  ;;  %v1231_v42 = vld [vmem:[#allocation3 + $0x1a9] sm:$0xff]  ;;  %v872_v8 = vmul.f32 0.036000773, %v2804_v33  ;;  %v1328_v46 = vld [vmem:[#allocation3 + $0x1b2] sm:$0xff]  ;;  %v1199_v44 = vadd.f32 %v2758_v55, %v1103_v20  ;;  %v1008_v40 = vadd.f32 %v976_v63, %v912_v16  ;;  %v564_v16 = vpop.f32.mrf.mxu2 }
 0x114   : > { %v936_v49 = vld [vmem:[#allocation3 + $0x12e] sm:$0xff]  ;;  %v1263_v4 = vmul.f32 0.21300554, %v1231_v42  ;;  %v2828_v50 = vmul.f32 0.21300554, %v1232_v28  ;;  %v993_v25 = vadd.f32 %v961_v15, %v897_v47  ;;  %658 = vst.msk [vmem:[#allocation3 + $0x1d0] sm:$0xff] %vm289_vm0, %v588_v5  ;;  %v2842_v28 = vmul.f32 %v2822_v62, %v2822_v62 }
 0x115   : > { %v1327_v1 = vld [vmem:[#allocation3 + $0x1aa] sm:$0xff]  ;;  %v904_v30 = vadd.f32 %v872_v8, %v808_v18  ;;  %v968_v52 = vmul.f32 0.10936069, %v936_v49  ;;  %v1064_v3 = vmul.f32 0.21300554, %v1032_v14  ;;  %v1410_v55 = vld [vmem:[#allocation3 + $0x1b3] sm:$0xff]  ;;  %v1081_v18 = vadd.f32 %v2770_v41, %v985_v27 }
 0x116   : > { %v1223_v34 = vld [vmem:[#allocation3 + $0x129] sm:$0xff]  ;;  %v2834_v43 = vmul.f32 0.10936069, %v1327_v1  ;;  %v1224_v24 = vld [vmem:[#allocation3 + $0x131] sm:$0xff]  ;;  %v2851_v8 = vmul.f32 0.036000773, %v2763_v59 }
 0x117   : > { %v1255_v35 = vmul.f32 0.21300554, %v1223_v34  ;;  %v1319_v10 = vld [vmem:[#allocation3 + $0x12a] sm:$0xff]  ;;  %v1000_v60 = vadd.f32 %v968_v52, %v904_v30  ;;  %v1320_v14 = vld [vmem:[#allocation3 + $0x132] sm:$0xff]  ;;  %v1256_v30 = vmul.f32 0.21300554, %v1224_v24 }
 0x118   : > { %v2830_v9 = vld [vmem:[#allocation3 + $0x4b] sm:$0xff]  ;;  %v1351_v23 = vmul.f32 0.10936069, %v1319_v10  ;;  %v1490_v10 = vld [vmem:[#allocation3 + $0x1b4] sm:$0xff]  ;;  %v1431_v52 = vmul.f32 0.036000773, %v2794_v45 }
 0x119   : > { %v1128_v58 = vld [vmem:[#allocation3 + $0x130] sm:$0xff]  ;;  %v1287_v48 = vadd.f32 %v1255_v35, %v1191_v2  ;;  %v698_v49 = vmul.f32 0.0010283801, %v2830_v9  ;;  %v2847_v2 = vmul.f32 0.10936069, %v1328_v46  ;;  %v1096_v15 = vadd.f32 %v1064_v3, %v1000_v60  ;;  %650 = vst.msk [vmem:[#allocation3 + $0x150] sm:$0xff] %vm289_vm0, %v564_v16 }
 0x11a   : > { %v730_v13 = vld [vmem:[#allocation3 + $0x4c] sm:$0xff]  ;;  %v1160_v20 = vmul.f32 0.26601171, %v1128_v58  ;;  %v1089_v35 = vadd.f32 %v2796_v56, %v993_v25  ;;  %v1104_v3 = vadd.f32 %v1072_v11, %v1008_v40  ;;  %v2857_v58 = vmul.f32 0.036000773, %v1410_v55 }
 0x11b   : > { %v2837_v42 = vld [vmem:[#allocation3 + $0x4d] sm:$0xff]  ;;  %v2845_v6 = vmul.f32 0.007598758, %v730_v13  ;;  %v1383_v47 = vadd.f32 %v1351_v23, %v1287_v48  ;;  %v1295_v60 = vadd.f32 %v1263_v4, %v1199_v44  ;;  %v1352_v13 = vmul.f32 0.10936069, %v1320_v14 }
 0x11c   : > { %v922_v1 = vld [vmem:[#allocation3 + $0x4e] sm:$0xff]  ;;  %v858_v34 = vmul.f32 0.036000773, %v2837_v42  ;;  %v1192_v5 = vadd.f32 %v1160_v20, %v1096_v15  ;;  %v1177_v25 = vadd.f32 %v2786_v26, %v1081_v18  ;;  %v2863_v45 = vmul.f32 0.007598758, %v1490_v10 }
 0x11d   : > { %v794_v63 = vadd.f32 %v2845_v6, %v698_v49  ;;  %v1018_v46 = vld [vmem:[#allocation3 + $0x4f] sm:$0xff]  ;;  %v954_v59 = vmul.f32 0.10936069, %v922_v1  ;;  %v1463_v49 = vadd.f32 %v1431_v52, %v1383_v47  ;;  %v1185_v55 = vadd.f32 %v2798_v53, %v1089_v35 }
 0x11e   : > { %v1114_v27 = vld [vmem:[#allocation3 + $0x50] sm:$0xff]  ;;  %v1288_v23 = vadd.f32 %v1256_v30, %v1192_v5  ;;  %v1050_v24 = vmul.f32 0.21300554, %v1018_v46  ;;  %v1200_v47 = vadd.f32 %v2815_v36, %v1104_v3  ;;  %v1391_v18 = vadd.f32 %v2834_v43, %v1295_v60 }
 0x11f   : > { %v890_v41 = vadd.f32 %v858_v34, %v794_v63  ;;  %v1209_v48 = vld [vmem:[#allocation3 + $0x49] sm:$0xff]  ;;  %v1406_v11 = vld [vmem:[#allocation3 + $0x133] sm:$0xff]  ;;  %v1146_v20 = vmul.f32 0.26601171, %v1114_v27  ;;  %v2874_v16 = vmul.f32 0.0010283801, %v2788_v21  ;;  %v1527_v35 = vadd.f32 %v1463_v49, %v2813_v29  ;;  %v522_v27 = vpop.f32.mrf.mxu0 }
 0x120   : > { %v2859_v51 = vld [vmem:[#allocation3 + $0xcb] sm:$0xff]  ;;  %v1384_v15 = vadd.f32 %v1352_v13, %v1288_v23  ;;  %v1241_v4 = vmul.f32 0.21300554, %v1209_v48  ;;  %v1432_v53 = vmul.f32 0.036000773, %v1406_v11  ;;  %v1554_v30 = vld [vmem:[#allocation3 + $0x1b5] sm:$0xff]  ;;  %v1296_v23 = vadd.f32 %v2828_v50, %v1200_v47 }
 0x121   : > { %v738_v56 = vld [vmem:[#allocation3 + $0xcc] sm:$0xff]  ;;  %v986_v40 = vadd.f32 %v954_v59, %v890_v41  ;;  %v706_v63 = vmul.f32 0.0010283801, %v2859_v51  ;;  %v1486_v52 = vld [vmem:[#allocation3 + $0x134] sm:$0xff]  ;;  %v1575_v43 = vmul.f32 0.0010283801, %v2804_v33  ;;  %v2886_v47 = vadd.f32 %v2826_v32, %v2792_v37 }
 0x122   : > { %v2866_v44 = vld [vmem:[#allocation3 + $0xcd] sm:$0xff]  ;;  %v2870_v34 = vmul.f32 0.007598758, %v738_v56  ;;  %v1550_v36 = vld [vmem:[#allocation3 + $0x135] sm:$0xff]  ;;  %v1273_v3 = vadd.f32 %v1241_v4, %v1177_v25  ;;  %v1464_v48 = vadd.f32 %v1432_v53, %v1384_v15  ;;  %v1502_v25 = vmul.f32 0.007598758, %v1486_v52 }
 0x123   : > { %v1082_v1 = vadd.f32 %v1050_v24, %v986_v40  ;;  %v1210_v14 = vld [vmem:[#allocation3 + $0x51] sm:$0xff]  ;;  %v1217_v26 = vld [vmem:[#allocation3 + $0xc9] sm:$0xff]  ;;  %v866_v59 = vmul.f32 0.036000773, %v2866_v44  ;;  %v546_v40 = vpop.f32.mrf.mxu1  ;;  %v2881_v24 = vmul.f32 0.0010283801, %v1554_v30  ;;  %v1607_v33 = vadd.f32 %v1575_v43, %v1527_v35 }
 0x124   : > { %v1305_v10 = vld [vmem:[#allocation3 + $0x4a] sm:$0xff]  ;;  %v802_v41 = vadd.f32 %v2870_v34, %v706_v63  ;;  %v1242_v21 = vmul.f32 0.21300554, %v1210_v14  ;;  %v1249_v60 = vmul.f32 0.21300554, %v1217_v26  ;;  %v1306_v29 = vld [vmem:[#allocation3 + $0x52] sm:$0xff]  ;;  %v1528_v50 = vadd.f32 %v1502_v25, %v1464_v48 }
 0x125   : > { %v930_v5 = vld [vmem:[#allocation3 + $0xce] sm:$0xff]  ;;  %v1178_v46 = vadd.f32 %v1146_v20, %v1082_v1  ;;  %v1337_v13 = vmul.f32 0.10936069, %v1305_v10  ;;  %636 = vst.msk [vmem:[#allocation3 + $0x70] sm:$0xff] %vm289_vm0, %v522_v27  ;;  %v1576_v15 = vmul.f32 0.0010283801, %v1550_v36  ;;  %v1392_v30 = vadd.f32 %v2847_v2, %v1296_v23 }
 0x126   : > { %v898_v49 = vadd.f32 %v866_v59, %v802_v41  ;;  %v962_v56 = vmul.f32 0.10936069, %v930_v5  ;;  %v1313_v11 = vld [vmem:[#allocation3 + $0xca] sm:$0xff]  ;;  %v1281_v1 = vadd.f32 %v1249_v60, %v1185_v55  ;;  %v1399_v63 = vld [vmem:[#allocation3 + $0x53] sm:$0xff]  ;;  %3225 = vst [vmem:[#allocation18_spill] sm:$0xff] %v2886_v47  ;;  %v1471_v55 = vadd.f32 %v2851_v8, %v1391_v18 }
 0x127   : > { %v1274_v20 = vadd.f32 %v1242_v21, %v1178_v46  ;;  %v1026_v4 = vld [vmem:[#allocation3 + $0xcf] sm:$0xff]  ;;  %v1369_v14 = vadd.f32 %v1337_v13, %v1273_v3  ;;  %v1338_v53 = vmul.f32 0.10936069, %v1306_v29  ;;  %v1345_v5 = vmul.f32 0.10936069, %v1313_v11  ;;  %644 = vst.msk [vmem:[#allocation3 + $0xf0] sm:$0xff] %vm289_vm0, %v546_v40 }
 0x128   : > { %v994_v26 = vadd.f32 %v962_v56, %v898_v49  ;;  %v1479_v10 = vld [vmem:[#allocation3 + $0x54] sm:$0xff]  ;;  %v1417_v52 = vmul.f32 0.036000773, %v2830_v9  ;;  %v1058_v35 = vmul.f32 0.21300554, %v1026_v4  ;;  %v689_v46 = vld [vmem:[#allocation3 + $0x1c3] sm:$0xff]  ;;  %v2894_v3 = vadd.f32 %v2842_v28, %v2808_v54  ;;  %v591_v28 = vpop.f32.mrf.mxu3 }
 0x129   : > { %v1122_v36 = vld [vmem:[#allocation3 + $0xd0] sm:$0xff]  ;;  %v1370_v37 = vadd.f32 %v1338_v53, %v1274_v20  ;;  %v1418_v32 = vmul.f32 0.036000773, %v1399_v63  ;;  %v1377_v41 = vadd.f32 %v1345_v5, %v1281_v1  ;;  %v753_v59 = vld [vmem:[#allocation3 + $0x1c4] sm:$0xff]  ;;  %v1655_v43 = vsub.f32 %v1607_v33, %v2886_v47  ;;  %659 = vst.msk [vmem:[#allocation3 + $0x1e8] sm:$0xff] %vm289_vm0, %v591_v28  ;;  %v567_v53 = vpop.f32.mrf.mxu2 }
 0x12a   : > { %3226 = vst [vmem:[#allocation19_spill] sm:$0xff] %v2894_v3  ;;  %v681_v27 = vld [vmem:[#allocation3 + $0x143] sm:$0xff]  ;;  %v1449_v2 = vadd.f32 %v1417_v52, %v1369_v14  ;;  %v1495_v21 = vmul.f32 0.007598758, %v1479_v10  ;;  %v1543_v8 = vld [vmem:[#allocation3 + $0x55] sm:$0xff]  ;;  %v1090_v18 = vadd.f32 %v1058_v35, %v994_v26  ;;  %v1608_v23 = vadd.f32 %v1576_v15, %v1528_v50 }
 0x12b   : > { %v745_v48 = vld [vmem:[#allocation3 + $0x144] sm:$0xff]  ;;  %v1218_v9 = vld [vmem:[#allocation3 + $0xd1] sm:$0xff]  ;;  %v1154_v29 = vmul.f32 0.26601171, %v1122_v36  ;;  %v1425_v13 = vmul.f32 0.036000773, %v2859_v51  ;;  %v1472_v49 = vadd.f32 %v2857_v58, %v1392_v30  ;;  %v1450_v25 = vadd.f32 %v1418_v32, %v1370_v37 }
 0x12c   : > { %v1314_v60 = vld [vmem:[#allocation3 + $0xd2] sm:$0xff]  ;;  %v721_v54 = vmul.f32 0.0010283801, %v689_v46  ;;  %v785_v56 = vmul.f32 0.007598758, %v753_v59  ;;  %v849_v33 = vld [vmem:[#allocation3 + $0x1c5] sm:$0xff]  ;;  %v2902_v14 = vmul.f32 %v2811_v61, %v2766_v12  ;;  %v1535_v15 = vadd.f32 %v1471_v55, %v2780_v0 }
 0x12d   : > { %v713_v11 = vmul.f32 0.0010283801, %v681_v27  ;;  %v777_v40 = vmul.f32 0.007598758, %v745_v48  ;;  %v1561_v20 = vmul.f32 0.0010283801, %v2837_v42  ;;  %v1457_v1 = vadd.f32 %v1425_v13, %v1377_v41 }
 0x12e   : > { %v1562_v4 = vmul.f32 0.0010283801, %v1543_v8  ;;  %v2905_v51 = vadd.f32 0.0009, %v1655_v43  ;;  %v1186_v63 = vadd.f32 %v1154_v29, %v1090_v18  ;;  %v1403_v26 = vld [vmem:[#allocation3 + $0xd3] sm:$0xff]  ;;  %v1656_v42 = vsub.f32 %v1608_v23, %v2894_v3  ;;  %v841_v52 = vld [vmem:[#allocation3 + $0x145] sm:$0xff] }
 0x12f   : > { %v1483_v58 = vld [vmem:[#allocation3 + $0xd4] sm:$0xff]  ;;  %v1513_v10 = vadd.f32 %v1449_v2, %v2845_v6  ;;  %v1250_v5 = vmul.f32 0.21300554, %v1218_v9  ;;  %v1346_v30 = vmul.f32 0.10936069, %v1314_v60  ;;  %651 = vst.msk [vmem:[#allocation3 + $0x168] sm:$0xff] %vm289_vm0, %v567_v53  ;;  %v1536_v12 = vadd.f32 %v2863_v45, %v1472_v49 }
 0x130   : > { %3227 = vst [vmem:[#allocation20_spill] sm:$0xff] %v2905_v51  ;;  %v1547_v50 = vld [vmem:[#allocation3 + $0xd5] sm:$0xff]  ;;  %v817_v0 = vadd.f32 %v785_v56, %v721_v54  ;;  %v881_v61 = vmul.f32 0.036000773, %v849_v33  ;;  %v945_v55 = vld [vmem:[#allocation3 + $0x1c6] sm:$0xff]  ;;  %v809_v46 = vadd.f32 %v777_v40, %v713_v11  ;;  %v1514_v37 = vadd.f32 %v1495_v21, %v1450_v25 }
 0x131   : > { %v1041_v35 = vld [vmem:[#allocation3 + $0x1c7] sm:$0xff]  ;;  %v1426_v32 = vmul.f32 0.036000773, %v1403_v26  ;;  %v2912_v41 = vmul.f32 0.007598758, %v1483_v58  ;;  %v1521_v59 = vadd.f32 %v1457_v1, %v2870_v34  ;;  %v1282_v48 = vadd.f32 %v1250_v5, %v1186_v63  ;;  %v1330_v51 = vld [vmem:[#allocation3 + $0x1d2] sm:$0xff] }
 0x132   : > { %v1137_v36 = vld [vmem:[#allocation3 + $0x1c8] sm:$0xff]  ;;  %v1569_v43 = vmul.f32 0.0010283801, %v2866_v44  ;;  %v2916_v2 = vmul.f32 0.0010283801, %v1547_v50  ;;  %v2920_v8 = vmul.f32 %v2822_v62, %v2783_v17  ;;  %v1593_v21 = vadd.f32 %v1561_v20, %v1513_v10  ;;  %v1400_v38 = vld [vmem:[#allocation3 + $0x73] sm:$0xff] }
 0x133   : > { %v937_v6 = vld [vmem:[#allocation3 + $0x146] sm:$0xff]  ;;  %v873_v45 = vmul.f32 0.036000773, %v841_v52  ;;  %v2922_v18 = vadd.f32 0.0009, %v1656_v42  ;;  %v2927_v34 = vadd.f32 %v2874_v16, %v1535_v15  ;;  %v913_v13 = vadd.f32 %v881_v61, %v817_v0  ;;  %v1480_v57 = vld [vmem:[#allocation3 + $0x74] sm:$0xff] }
 0x134   : > { %v1033_v27 = vld [vmem:[#allocation3 + $0x147] sm:$0xff]  ;;  %v977_v9 = vmul.f32 0.10936069, %v945_v55  ;;  %v1073_v44 = vmul.f32 0.21300554, %v1041_v35  ;;  %v2929_v11 = vadd.f32 %v1562_v4, %v1514_v37  ;;  %v1601_v17 = vadd.f32 %v1569_v43, %v1521_v59 }
 0x135   : > { %3228 = vst [vmem:[#allocation21_spill] sm:$0xff] %v2922_v18  ;;  %v1129_v60 = vld [vmem:[#allocation3 + $0x148] sm:$0xff]  ;;  %v905_v54 = vadd.f32 %v873_v45, %v809_v46  ;;  %v2931_v62 = vmul.f32 0.26601171, %v1137_v36  ;;  %v969_v40 = vmul.f32 0.10936069, %v937_v6  ;;  %v2934_v1 = vadd.f32 %v2881_v24, %v1536_v12 }
 0x136   : > { %v667_v23 = vld [vmem:[#allocation3 + $0x63] sm:$0xff]  ;;  %v2924_v29 = vld [vmem:[#allocation3 + $0x1cb] sm:$0xff]  ;;  %v1378_v33 = vadd.f32 %v1346_v30, %v1282_v48  ;;  %v1065_v16 = vmul.f32 0.21300554, %v1033_v27  ;;  %v2939_v4 = vmul.f32 %v1593_v21, %v1593_v21  ;;  %v1009_v52 = vadd.f32 %v977_v9, %v913_v13 }
 0x137   : > { %v731_v28 = vld [vmem:[#allocation3 + $0x64] sm:$0xff]  ;;  %v754_v56 = vld [vmem:[#allocation3 + $0x1cc] sm:$0xff]  ;;  %v722_v58 = vmul.f32 0.0010283801, %v2924_v29  ;;  %v699_v53 = vmul.f32 0.0010283801, %v667_v23  ;;  %v1001_v0 = vadd.f32 %v969_v40, %v905_v54  ;;  %v2945_v55 = vmul.f32 %v2929_v11, %v2929_v11 }
 0x138   : > { %v827_v49 = vld [vmem:[#allocation3 + $0x65] sm:$0xff]  ;;  %v2937_v50 = vld [vmem:[#allocation3 + $0x1cd] sm:$0xff]  ;;  %v763_v42 = vmul.f32 0.007598758, %v731_v28  ;;  %v2941_v5 = vmul.f32 0.007598758, %v754_v56  ;;  %v2947_v35 = vmul.f32 %v1601_v17, %v1593_v21  ;;  %v1458_v27 = vadd.f32 %v1426_v32, %v1378_v33 }
 0x139   : > { %v923_v25 = vld [vmem:[#allocation3 + $0x66] sm:$0xff]  ;;  %v1161_v24 = vmul.f32 0.26601171, %v1129_v60  ;;  %v859_v12 = vmul.f32 0.036000773, %v827_v49  ;;  %v946_v59 = vld [vmem:[#allocation3 + $0x1ce] sm:$0xff]  ;;  %v2953_v23 = vmul.f32 %v1601_v17, %v1601_v17  ;;  %v1105_v56 = vadd.f32 %v1073_v44, %v1009_v52 }
 0x13a   : > { %v675_v20 = vld [vmem:[#allocation3 + $0xe3] sm:$0xff]  ;;  %v2949_v6 = vld [vmem:[#allocation3 + $0x14b] sm:$0xff]  ;;  %v955_v48 = vmul.f32 0.10936069, %v923_v25  ;;  %v818_v43 = vadd.f32 %v2941_v5, %v722_v58  ;;  %v882_v45 = vmul.f32 0.036000773, %v2937_v50  ;;  %v795_v13 = vadd.f32 %v763_v42, %v699_v53 }
 0x13b   : > { %v1019_v15 = vld [vmem:[#allocation3 + $0x67] sm:$0xff]  ;;  %v707_v36 = vmul.f32 0.0010283801, %v675_v20  ;;  %v1042_v9 = vld [vmem:[#allocation3 + $0x1cf] sm:$0xff]  ;;  %v1097_v40 = vadd.f32 %v1065_v16, %v1001_v0  ;;  %v714_v25 = vmul.f32 0.0010283801, %v2949_v6 }
 0x13c   : > { %v1115_v63 = vld [vmem:[#allocation3 + $0x68] sm:$0xff]  ;;  %v2955_v54 = vmul.f32 0.21300554, %v1019_v15  ;;  %v1138_v28 = vld [vmem:[#allocation3 + $0x1d0] sm:$0xff]  ;;  %v1522_v15 = vadd.f32 %v2912_v41, %v1458_v27  ;;  %v914_v53 = vadd.f32 %v882_v45, %v818_v43  ;;  %v978_v42 = vmul.f32 0.10936069, %v946_v59 }
 0x13d   : > { %v739_v26 = vld [vmem:[#allocation3 + $0xe4] sm:$0xff]  ;;  %v746_v60 = vld [vmem:[#allocation3 + $0x14c] sm:$0xff]  ;;  %v2957_v21 = vmul.f32 0.26601171, %v1115_v63  ;;  %v891_v52 = vadd.f32 %v859_v12, %v795_v13  ;;  %v1074_v0 = vmul.f32 0.21300554, %v1042_v9  ;;  %v1201_v59 = vadd.f32 %v2931_v62, %v1105_v56 }
 0x13e   : > { %v835_v10 = vld [vmem:[#allocation3 + $0xe5] sm:$0xff]  ;;  %v771_v46 = vmul.f32 0.007598758, %v739_v26  ;;  %v1234_v32 = vld [vmem:[#allocation3 + $0x1d1] sm:$0xff]  ;;  %v2964_v17 = vmul.f32 0.007598758, %v746_v60 }
 0x13f   : > { %v931_v30 = vld [vmem:[#allocation3 + $0xe6] sm:$0xff]  ;;  %v867_v20 = vmul.f32 0.036000773, %v835_v10  ;;  %v938_v16 = vld [vmem:[#allocation3 + $0x14e] sm:$0xff]  ;;  %v594_v10 = vpop.f32.mrf.mxu3  ;;  %v2971_v3 = vmul.f32 0.21300554, %v1234_v32  ;;  %v987_v32 = vadd.f32 %v955_v48, %v891_v52 }
 0x140   : > { %v1027_v61 = vld [vmem:[#allocation3 + $0xe7] sm:$0xff]  ;;  %v803_v26 = vadd.f32 %v771_v46, %v707_v36  ;;  %v963_v58 = vmul.f32 0.10936069, %v931_v30  ;;  %v810_v22 = vadd.f32 %v2964_v17, %v714_v25  ;;  %v1193_v36 = vadd.f32 %v1161_v24, %v1097_v40  ;;  %v1411_v41 = vld [vmem:[#allocation3 + $0x1d3] sm:$0xff]  ;;  %660 = vst.msk [vmem:[#allocation3 + $0x1f0] sm:$0xff] %vm289_vm0, %v594_v10 }
 0x141   : > { %v1123_v37 = vld [vmem:[#allocation3 + $0xe8] sm:$0xff]  ;;  %v2962_v18 = vmul.f32 0.21300554, %v1027_v61  ;;  %v1170_v46 = vmul.f32 0.26601171, %v1138_v28  ;;  %v1491_v43 = vld [vmem:[#allocation3 + $0x1d4] sm:$0xff]  ;;  %v1010_v25 = vadd.f32 %v978_v42, %v914_v53  ;;  %v1602_v40 = vadd.f32 %v2916_v2, %v1522_v15 }
 0x142   : > { %v1233_v49 = vld [vmem:[#allocation3 + $0x1c9] sm:$0xff]  ;;  %v2967_v63 = vmul.f32 0.26601171, %v1123_v37  ;;  %v570_v37 = vpop.f32.mrf.mxu2  ;;  %v899_v27 = vadd.f32 %v867_v20, %v803_v26  ;;  %v970_v12 = vmul.f32 0.10936069, %v938_v16  ;;  %v1555_v28 = vld [vmem:[#allocation3 + $0x1d5] sm:$0xff] }
 0x143   : > { %v2960_v33 = vld [vmem:[#allocation3 + $0x14d] sm:$0xff]  ;;  %v1265_v60 = vmul.f32 0.21300554, %v1233_v49  ;;  %v2977_v24 = vmul.f32 0.10936069, %v1330_v51  ;;  %652 = vst.msk [vmem:[#allocation3 + $0x170] sm:$0xff] %vm289_vm0, %v570_v37  ;;  %v1106_v15 = vadd.f32 %v1074_v0, %v1010_v25 }
 0x144   : > { %v1329_v44 = vld [vmem:[#allocation3 + $0x1ca] sm:$0xff]  ;;  %v874_v30 = vmul.f32 0.036000773, %v2960_v33  ;;  %v1441_v62 = vmul.f32 0.036000773, %v2924_v29  ;;  %v995_v51 = vadd.f32 %v963_v58, %v899_v27  ;;  %v1322_v29 = vld [vmem:[#allocation3 + $0x152] sm:$0xff]  ;;  %v1083_v27 = vadd.f32 %v2955_v54, %v987_v32 }
 0x145   : > { %v1225_v61 = vld [vmem:[#allocation3 + $0x149] sm:$0xff]  ;;  %v1361_v47 = vmul.f32 0.10936069, %v1329_v44  ;;  %v1297_v44 = vadd.f32 %v1265_v60, %v1201_v59  ;;  %v2985_v10 = vmul.f32 0.036000773, %v1411_v41  ;;  %v1226_v48 = vld [vmem:[#allocation3 + $0x151] sm:$0xff] }
 0x146   : > { %v906_v45 = vadd.f32 %v874_v30, %v810_v22  ;;  %v1034_v9 = vld [vmem:[#allocation3 + $0x14f] sm:$0xff]  ;;  %v1257_v49 = vmul.f32 0.21300554, %v1225_v61  ;;  %v2987_v2 = vmul.f32 0.007598758, %v1491_v43  ;;  %v1091_v25 = vadd.f32 %v2962_v18, %v995_v51 }
 0x147   : > { %v2974_v13 = vld [vmem:[#allocation3 + $0x6b] sm:$0xff]  ;;  %v1066_v16 = vmul.f32 0.21300554, %v1034_v9  ;;  %v2990_v52 = vmul.f32 0.0010283801, %v2937_v50  ;;  %v1407_v60 = vld [vmem:[#allocation3 + $0x153] sm:$0xff] }
 0x148   : > { %v1002_v56 = vadd.f32 %v970_v12, %v906_v45  ;;  %v1130_v20 = vld [vmem:[#allocation3 + $0x150] sm:$0xff]  ;;  %v1289_v30 = vadd.f32 %v1257_v49, %v1193_v36  ;;  %v700_v53 = vmul.f32 0.0010283801, %v2974_v13  ;;  %v2995_v36 = vmul.f32 %v1602_v40, %v2929_v11 }
 0x149   : > { %v1321_v22 = vld [vmem:[#allocation3 + $0x14a] sm:$0xff]  ;;  %v2997_v12 = vmul.f32 0.0010283801, %v1555_v28  ;;  %v1162_v58 = vmul.f32 0.26601171, %v1130_v20  ;;  %v1487_v41 = vld [vmem:[#allocation3 + $0x154] sm:$0xff]  ;;  %v1393_v49 = vadd.f32 %v1361_v47, %v1297_v44  ;;  %v1202_v20 = vadd.f32 %v1170_v46, %v1106_v15 }
 0x14a   : > { %v732_v26 = vld [vmem:[#allocation3 + $0x6c] sm:$0xff]  ;;  %v1098_v61 = vadd.f32 %v1066_v16, %v1002_v56  ;;  %v1353_v37 = vmul.f32 0.10936069, %v1321_v22  ;;  %v1258_v0 = vmul.f32 0.21300554, %v1226_v48  ;;  %v1551_v9 = vld [vmem:[#allocation3 + $0x155] sm:$0xff]  ;;  %v1179_v48 = vadd.f32 %v2957_v21, %v1083_v27 }
 0x14b   : > { %v2983_v42 = vmul.f32 0.007598758, %v732_v26  ;;  %v2992_v45 = vld [vmem:[#allocation3 + $0x6d] sm:$0xff]  ;;  %v1354_v43 = vmul.f32 0.10936069, %v1322_v29 }
 0x14c   : > { %v1385_v50 = vadd.f32 %v1353_v37, %v1289_v30  ;;  %v1433_v56 = vmul.f32 0.036000773, %v2949_v6  ;;  %v860_v11 = vmul.f32 0.036000773, %v2992_v45  ;;  %v924_v28 = vld [vmem:[#allocation3 + $0x6e] sm:$0xff]  ;;  %v1194_v26 = vadd.f32 %v1162_v58, %v1098_v61 }
 0x14d   : > { %v796_v59 = vadd.f32 %v2983_v42, %v700_v53  ;;  %v3004_v22 = vld [vmem:[#allocation3 + $0xeb] sm:$0xff]  ;;  %v3006_v16 = vmul.f32 0.036000773, %v1407_v60  ;;  %v3008_v53 = vmul.f32 0.007598758, %v1487_v41  ;;  %v3010_v30 = vmul.f32 %v1602_v40, %v1602_v40 }
 0x14e   : > { %v1020_v54 = vld [vmem:[#allocation3 + $0x6f] sm:$0xff]  ;;  %v1577_v18 = vmul.f32 0.0010283801, %v2960_v33  ;;  %v3013_v47 = vmul.f32 0.0010283801, %v1551_v9  ;;  %v1465_v29 = vadd.f32 %v1433_v56, %v1385_v50  ;;  %v3020_v58 = vadd.f32 %v2967_v63, %v1091_v25 }
 0x14f   : > { %v740_v32 = vld [vmem:[#allocation3 + $0xec] sm:$0xff]  ;;  %v892_v6 = vadd.f32 %v860_v11, %v796_v59  ;;  %v956_v46 = vmul.f32 0.10936069, %v924_v28  ;;  %v708_v61 = vmul.f32 0.0010283801, %v3004_v22  ;;  %v1473_v40 = vadd.f32 %v1441_v62, %v1393_v49 }
 0x150   : > { %v1116_v51 = vld [vmem:[#allocation3 + $0x70] sm:$0xff]  ;;  %v1052_v60 = vmul.f32 0.21300554, %v1020_v54  ;;  %v3022_v9 = vmul.f32 0.007598758, %v740_v32  ;;  %v1298_v59 = vadd.f32 %v2971_v3, %v1202_v20  ;;  %v1290_v11 = vadd.f32 %v1258_v0, %v1194_v26 }
 0x151   : > { %v1211_v44 = vld [vmem:[#allocation3 + $0x69] sm:$0xff]  ;;  %v1212_v15 = vld [vmem:[#allocation3 + $0x71] sm:$0xff]  ;;  %v1148_v21 = vmul.f32 0.26601171, %v1116_v51  ;;  %v988_v56 = vadd.f32 %v956_v46, %v892_v6  ;;  %v1529_v25 = vadd.f32 %v1465_v29, %v2964_v17  ;;  %v3033_v0 = vadd.f32 %v1473_v40, %v2941_v5 }
 0x152   : > { %v3017_v37 = vld [vmem:[#allocation3 + $0xed] sm:$0xff]  ;;  %v1243_v27 = vmul.f32 0.21300554, %v1211_v44  ;;  %v3025_v28 = vmul.f32 0.21300554, %v1212_v15  ;;  %v804_v63 = vadd.f32 %v3022_v9, %v708_v61  ;;  %v1544_v26 = vld [vmem:[#allocation3 + $0x75] sm:$0xff]  ;;  %v1394_v46 = vadd.f32 %v2977_v24, %v1298_v59 }
 0x153   : > { %v1307_v33 = vld [vmem:[#allocation3 + $0x6a] sm:$0xff]  ;;  %v1308_v41 = vld [vmem:[#allocation3 + $0x72] sm:$0xff]  ;;  %v868_v62 = vmul.f32 0.036000773, %v3017_v37  ;;  %v1419_v20 = vmul.f32 0.036000773, %v2974_v13  ;;  %v1386_v15 = vadd.f32 %v1354_v43, %v1290_v11 }
 0x154   : > { %v932_v50 = vld [vmem:[#allocation3 + $0xee] sm:$0xff]  ;;  %v1275_v49 = vadd.f32 %v1243_v27, %v1179_v48  ;;  %v1339_v54 = vmul.f32 0.10936069, %v1307_v33  ;;  %v3030_v32 = vmul.f32 0.10936069, %v1308_v41  ;;  %v691_v48 = vld [vmem:[#allocation3 + $0x1e3] sm:$0xff]  ;;  %v1084_v33 = vadd.f32 %v1052_v60, %v988_v56 }
 0x155   : > { %v1028_v3 = vld [vmem:[#allocation3 + $0xef] sm:$0xff]  ;;  %v900_v6 = vadd.f32 %v868_v62, %v804_v63  ;;  %v964_v51 = vmul.f32 0.10936069, %v932_v50  ;;  %v3037_v61 = vmul.f32 0.036000773, %v1400_v38  ;;  %v755_v29 = vld [vmem:[#allocation3 + $0x1e4] sm:$0xff]  ;;  %v3044_v27 = vadd.f32 %v1577_v18, %v1529_v25 }
 0x156   : > { %v1124_v44 = vld [vmem:[#allocation3 + $0xf0] sm:$0xff]  ;;  %v3039_v17 = vmul.f32 0.007598758, %v1480_v57  ;;  %v3042_v41 = vmul.f32 0.0010283801, %v2992_v45  ;;  %v851_v13 = vld [vmem:[#allocation3 + $0x1e5] sm:$0xff]  ;;  %v1371_v50 = vadd.f32 %v1339_v54, %v1275_v49  ;;  %v3050_v57 = vadd.f32 %v2953_v23, %v2939_v4 }
 0x157   : > { %v996_v5 = vadd.f32 %v964_v51, %v900_v6  ;;  %v1060_v40 = vmul.f32 0.21300554, %v1028_v3  ;;  %v3046_v63 = vmul.f32 0.0010283801, %v1544_v26  ;;  %v1156_v24 = vmul.f32 0.26601171, %v1124_v44 }
 0x158   : > { %v1219_v43 = vld [vmem:[#allocation3 + $0xe9] sm:$0xff]  ;;  %v723_v60 = vmul.f32 0.0010283801, %v691_v48  ;;  %v787_v11 = vmul.f32 0.007598758, %v755_v29  ;;  %v3053_v56 = vadd.f32 %v2985_v10, %v1394_v46  ;;  %v1466_v18 = vadd.f32 %v3006_v16, %v1386_v15  ;;  %v1220_v25 = vld [vmem:[#allocation3 + $0xf1] sm:$0xff] }
 0x159   : > { %v947_v38 = vld [vmem:[#allocation3 + $0x1e6] sm:$0xff]  ;;  %v1092_v59 = vadd.f32 %v1060_v40, %v996_v5  ;;  %v3058_v62 = vadd.f32 %v3010_v30, %v2945_v55  ;;  %v883_v49 = vmul.f32 0.036000773, %v851_v13  ;;  %v1180_v26 = vadd.f32 %v1148_v21, %v1084_v33 }
 0x15a   : > { %v683_v45 = vld [vmem:[#allocation3 + $0x163] sm:$0xff]  ;;  %v1251_v4 = vmul.f32 0.21300554, %v1219_v43  ;;  %v819_v6 = vadd.f32 %v787_v11, %v723_v60  ;;  %v979_v51 = vmul.f32 0.10936069, %v947_v38  ;;  %v1451_v46 = vadd.f32 %v1419_v20, %v1371_v50  ;;  %v3062_v29 = vld [vmem:[#allocation3 + $0x1eb] sm:$0xff] }
 0x15b   : > { %v1043_v54 = vld [vmem:[#allocation3 + $0x1e7] sm:$0xff]  ;;  %v715_v16 = vmul.f32 0.0010283801, %v683_v45  ;;  %v1188_v55 = vadd.f32 %v1156_v24, %v1092_v59  ;;  %v1252_v30 = vmul.f32 0.21300554, %v1220_v25  ;;  %v1530_v33 = vadd.f32 %v3008_v53, %v1466_v18  ;;  %v1316_v25 = vld [vmem:[#allocation3 + $0xf2] sm:$0xff] }
 0x15c   : > { %v747_v3 = vld [vmem:[#allocation3 + $0x164] sm:$0xff]  ;;  %v915_v5 = vadd.f32 %v883_v49, %v819_v6  ;;  %v1075_v40 = vmul.f32 0.21300554, %v1043_v54  ;;  %v756_v21 = vld [vmem:[#allocation3 + $0x1ec] sm:$0xff]  ;;  %v1276_v20 = vadd.f32 %v3025_v28, %v1180_v26  ;;  %v724_v10 = vmul.f32 0.0010283801, %v3062_v29 }
 0x15d   : > { %v1315_v23 = vld [vmem:[#allocation3 + $0xea] sm:$0xff]  ;;  %v779_v15 = vmul.f32 0.007598758, %v747_v3  ;;  %v1515_v59 = vadd.f32 %v1451_v46, %v2983_v42  ;;  %v3070_v6 = vmul.f32 0.007598758, %v756_v21  ;;  %v1283_v18 = vadd.f32 %v1251_v4, %v3020_v58 }
 0x15e   : > { %v843_v44 = vld [vmem:[#allocation3 + $0x165] sm:$0xff]  ;;  %v1347_v43 = vmul.f32 0.10936069, %v1315_v23  ;;  %v3065_v11 = vld [vmem:[#allocation3 + $0x1ed] sm:$0xff]  ;;  %v1011_v50 = vadd.f32 %v979_v51, %v915_v5  ;;  %v1284_v23 = vadd.f32 %v1252_v30, %v1188_v55  ;;  %v1372_v42 = vadd.f32 %v3030_v32, %v1276_v20 }
 0x15f   : > { %v1139_v48 = vld [vmem:[#allocation3 + $0x1e8] sm:$0xff]  ;;  %v811_v38 = vadd.f32 %v779_v15, %v715_v16  ;;  %v875_v60 = vmul.f32 0.036000773, %v843_v44  ;;  %v884_v28 = vmul.f32 0.036000773, %v3065_v11  ;;  %v1404_v51 = vld [vmem:[#allocation3 + $0xf3] sm:$0xff]  ;;  %v820_v15 = vadd.f32 %v3070_v6, %v724_v10 }
 0x160   : > { %v939_v13 = vld [vmem:[#allocation3 + $0x166] sm:$0xff]  ;;  %v1171_v45 = vmul.f32 0.26601171, %v1139_v48  ;;  %v948_v24 = vld [vmem:[#allocation3 + $0x1ee] sm:$0xff]  ;;  %v1107_v44 = vadd.f32 %v1075_v40, %v1011_v50  ;;  %v1348_v46 = vmul.f32 0.10936069, %v1316_v25  ;;  %v3077_v58 = vadd.f32 %v3013_v47, %v1530_v33 }
 0x161   : > { %v1035_v3 = vld [vmem:[#allocation3 + $0x167] sm:$0xff]  ;;  %v907_v49 = vadd.f32 %v875_v60, %v811_v38  ;;  %v971_v54 = vmul.f32 0.10936069, %v939_v13  ;;  %v1044_v26 = vld [vmem:[#allocation3 + $0x1ef] sm:$0xff]  ;;  %v980_v5 = vmul.f32 0.10936069, %v948_v24  ;;  %v916_v55 = vadd.f32 %v884_v28, %v820_v15 }
 0x162   : > { %v1235_v53 = vld [vmem:[#allocation3 + $0x1e9] sm:$0xff]  ;;  %v1067_v16 = vmul.f32 0.21300554, %v1035_v3  ;;  %v1203_v13 = vadd.f32 %v1171_v45, %v1107_v44  ;;  %v1076_v30 = vmul.f32 0.21300554, %v1044_v26  ;;  %v1236_v40 = vld [vmem:[#allocation3 + $0x1f1] sm:$0xff]  ;;  %v1380_v3 = vadd.f32 %v1348_v46, %v1284_v23 }
 0x163   : > { %v1003_v48 = vadd.f32 %v971_v54, %v907_v49  ;;  %v1131_v21 = vld [vmem:[#allocation3 + $0x168] sm:$0xff]  ;;  %v1140_v38 = vld [vmem:[#allocation3 + $0x1f0] sm:$0xff]  ;;  %v1267_v60 = vmul.f32 0.21300554, %v1235_v53  ;;  %v1379_v49 = vadd.f32 %v1347_v43, %v1283_v18  ;;  %v1427_v10 = vmul.f32 0.036000773, %v3004_v22 }
 0x164   : > { %v1331_v50 = vld [vmem:[#allocation3 + $0x1ea] sm:$0xff]  ;;  %v1428_v24 = vmul.f32 0.036000773, %v1404_v51  ;;  %v3081_v20 = vadd.f32 %v3042_v41, %v1515_v59  ;;  %v1484_v45 = vld [vmem:[#allocation3 + $0xf4] sm:$0xff]  ;;  %v1163_v25 = vmul.f32 0.26601171, %v1131_v21  ;;  %v1012_v53 = vadd.f32 %v980_v5, %v916_v55 }
 0x165   : > { %v1099_v4 = vadd.f32 %v1067_v16, %v1003_v48  ;;  %v684_v54 = vld [vmem:[#allocation3 + $0x16b] sm:$0xff]  ;;  %v1172_v47 = vmul.f32 0.26601171, %v1140_v38  ;;  %v1452_v44 = vadd.f32 %v3037_v61, %v1372_v42  ;;  %v1268_v28 = vmul.f32 0.21300554, %v1236_v40 }
 0x166   : > { %v748_v32 = vld [vmem:[#allocation3 + $0x16c] sm:$0xff]  ;;  %v1299_v26 = vadd.f32 %v1267_v60, %v1203_v13  ;;  %v1363_v48 = vmul.f32 0.10936069, %v1331_v50  ;;  %v1108_v23 = vadd.f32 %v1076_v30, %v1012_v53  ;;  %v716_v51 = vmul.f32 0.0010283801, %v684_v54  ;;  %v1548_v50 = vld [vmem:[#allocation3 + $0xf5] sm:$0xff] }
 0x167   : > { %v1332_v33 = vld [vmem:[#allocation3 + $0x1f2] sm:$0xff]  ;;  %v1227_v18 = vld [vmem:[#allocation3 + $0x169] sm:$0xff]  ;;  %v1195_v22 = vadd.f32 %v1163_v25, %v1099_v4  ;;  %v780_v16 = vmul.f32 0.007598758, %v748_v32  ;;  %v1459_v41 = vadd.f32 %v1427_v10, %v1379_v49  ;;  %v1460_v59 = vadd.f32 %v1428_v24, %v1380_v3 }
 0x168   : > { %v3084_v43 = vld [vmem:[#allocation3 + $0x16d] sm:$0xff]  ;;  %v1500_v46 = vmul.f32 0.007598758, %v1484_v45  ;;  %v1364_v21 = vmul.f32 0.10936069, %v1332_v33  ;;  %v1204_v38 = vadd.f32 %v1172_v47, %v1108_v23  ;;  %v1516_v13 = vadd.f32 %v3039_v17, %v1452_v44 }
 0x169   : > { %v940_v15 = vld [vmem:[#allocation3 + $0x16e] sm:$0xff]  ;;  %v812_v55 = vadd.f32 %v780_v16, %v716_v51  ;;  %v876_v61 = vmul.f32 0.036000773, %v3084_v43  ;;  %v1259_v42 = vmul.f32 0.21300554, %v1227_v18  ;;  %v1395_v60 = vadd.f32 %v1363_v48, %v1299_v26 }
 0x16a   : > { %v1323_v5 = vld [vmem:[#allocation3 + $0x16a] sm:$0xff]  ;;  %v1443_v40 = vmul.f32 0.036000773, %v3062_v29  ;;  %v972_v4 = vmul.f32 0.10936069, %v940_v15  ;;  %v1300_v32 = vadd.f32 %v1268_v28, %v1204_v38  ;;  %v1412_v25 = vld [vmem:[#allocation3 + $0x1f3] sm:$0xff]  ;;  %v1658_v24 = vsub.f32 %v3077_v58, %v3058_v62 }
 0x16b   : > { %v1036_v30 = vld [vmem:[#allocation3 + $0x16f] sm:$0xff]  ;;  %v908_v49 = vadd.f32 %v876_v61, %v812_v55  ;;  %v1291_v3 = vadd.f32 %v1259_v42, %v1195_v22  ;;  %v1355_v10 = vmul.f32 0.10936069, %v1323_v5  ;;  %v1523_v45 = vadd.f32 %v1459_v41, %v3022_v9 }
 0x16c   : > { %v1524_v53 = vadd.f32 %v1500_v46, %v1460_v59  ;;  %v1571_v47 = vmul.f32 0.0010283801, %v3017_v37  ;;  %v1132_v17 = vld [vmem:[#allocation3 + $0x170] sm:$0xff]  ;;  %v1068_v44 = vmul.f32 0.21300554, %v1036_v30  ;;  %v1596_v48 = vadd.f32 %v3046_v63, %v1516_v13 }
 0x16d   : > { %v1004_v33 = vadd.f32 %v972_v4, %v908_v49  ;;  %v1387_v29 = vadd.f32 %v1355_v10, %v1291_v3  ;;  %v1435_v26 = vmul.f32 0.036000773, %v684_v54  ;;  %v1572_v28 = vmul.f32 0.0010283801, %v1548_v50  ;;  %v1228_v22 = vld [vmem:[#allocation3 + $0x171] sm:$0xff] }
 0x16e   : > { %v1444_v18 = vmul.f32 0.036000773, %v1412_v25  ;;  %v1475_v23 = vadd.f32 %v1443_v40, %v1395_v60  ;;  %v1396_v51 = vadd.f32 %v1364_v21, %v1300_v32  ;;  %v1164_v5 = vmul.f32 0.26601171, %v1132_v17  ;;  %v1324_v59 = vld [vmem:[#allocation3 + $0x172] sm:$0xff] }
 0x16f   : > { %v1100_v15 = vadd.f32 %v1068_v44, %v1004_v33  ;;  %v1467_v58 = vadd.f32 %v1435_v26, %v1387_v29  ;;  %v3096_v9 = vadd.f32 %v2990_v52, %v3033_v0  ;;  %v1603_v37 = vadd.f32 %v1571_v47, %v1523_v45  ;;  %v1492_v38 = vld [vmem:[#allocation3 + $0x1f4] sm:$0xff] }
 0x170   : > { %v1604_v41 = vadd.f32 %v1572_v28, %v1524_v53  ;;  %v1661_v54 = vsub.f32 %v2773_v39, %v2732_v7  ;;  %v1538_v63 = vadd.f32 %v2987_v2, %v3053_v56  ;;  %v3229_v46 = vsub.f32 %v3044_v27, %v3050_v57  ;;  %v1408_v13 = vld [vmem:[#allocation3 + $0x173] sm:$0xff] }
 0x171   : > { %v1196_v55 = vadd.f32 %v1164_v5, %v1100_v15  ;;  %v1260_v61 = vmul.f32 0.21300554, %v1228_v22  ;;  %v3107_v42 = vadd.f32 0.0009, %v1658_v24  ;;  %v1635_v52 = vmul.f32 %v3081_v20, %v3081_v20  ;;  %v1556_v2 = vld [vmem:[#allocation3 + $0x1f5] sm:$0xff] }
 0x172   : > { %v3105_v21 = vadd.f32 0.0009, %v3229_v46  ;;  %v1636_v0 = vmul.f32 %v1596_v48, %v1596_v48  ;;  %v1531_v60 = vadd.f32 %v1467_v58, %v780_v16  ;;  %v1476_v40 = vadd.f32 %v1444_v18, %v1396_v51  ;;  %v1488_v25 = vld [vmem:[#allocation3 + $0x174] sm:$0xff] }
 0x173   : > { %v1539_v4 = vadd.f32 %v1475_v23, %v3070_v6  ;;  %v1292_v56 = vadd.f32 %v1260_v61, %v1196_v55  ;;  %v1356_v30 = vmul.f32 0.10936069, %v1324_v59  ;;  %v1643_v27 = vmul.f32 %v1603_v37, %v1603_v37  ;;  %v1552_v16 = vld [vmem:[#allocation3 + $0x175] sm:$0xff] }
 0x174   : > { %v1644_v50 = vmul.f32 %v1604_v41, %v1604_v41  ;;  %v1508_v32 = vmul.f32 0.007598758, %v1492_v38  ;;  %v1579_v49 = vmul.f32 0.0010283801, %v3084_v43  ;;  %v3114_v3 = vadd.f32 %v2997_v12, %v1538_v63  ;;  %v3237_v39 = vld [vmem:[#allocation21_spill] sm:$0xff] }
 0x175   : > { %v1587_v10 = vmul.f32 0.0010283801, %v3065_v11  ;;  %v1388_v24 = vadd.f32 %v1356_v30, %v1292_v56  ;;  %v1436_v45 = vmul.f32 0.036000773, %v1408_v13  ;;  %v3118_v53 = vmul.f32 %v1603_v37, %v3081_v20 }
 0x176   : > { %v3120_v6 = vmul.f32 %v1604_v41, %v1596_v48  ;;  %v1588_v47 = vmul.f32 0.0010283801, %v1556_v2  ;;  %v1611_v17 = vadd.f32 %v1579_v49, %v1531_v60  ;;  %v1540_v33 = vadd.f32 %v1508_v32, %v1476_v40  ;;  %v3232_v60 = vld [vmem:[#allocation18_spill] sm:$0xff]  ;;  %v3233_v2 = vld [vmem:[#allocation19_spill] sm:$0xff]  ;;  %v3235_v49 = vld [vmem:[#allocation17_spill] sm:$0xff] }
 0x177   : > { %v1619_v44 = vadd.f32 %v1587_v10, %v1539_v4  ;;  %v1468_v29 = vadd.f32 %v1436_v45, %v1388_v24  ;;  %v1504_v26 = vmul.f32 0.007598758, %v1488_v25  ;;  %v1580_v43 = vmul.f32 0.0010283801, %v1552_v16  ;;  %v3236_v10 = vld [vmem:[#allocation20_spill] sm:$0xff] }
 0x178   : > { %v1651_v28 = vadd.f32 %v1643_v27, %v1635_v52  ;;  %v1652_v12 = vadd.f32 %v1644_v50, %v1636_v0  ;;  %v1662_v11 = vsub.f32 %v2776_v19, %v2747_v31  ;;  %v1669_v23 = vmul.f32 2.0, %v2732_v7  ;;  %v3234_v27 = vld [vmem:[#allocation16_spill] sm:$0xff] }
 0x179   : > { %v1532_v18 = vadd.f32 %v1504_v26, %v1468_v29  ;;  %v1670_v20 = vmul.f32 2.0, %v2747_v31  ;;  %v1671_v48 = vmul.f32 2.0, %v2902_v14  ;;  %v1663_v51 = vsub.f32 %v2927_v34, %v2902_v14 }
 0x17a   : > { %v1659_v22 = vsub.f32 %v1611_v17, %v1651_v28  ;;  %v1664_v15 = vsub.f32 %v2934_v1, %v2920_v8  ;;  %v1672_v5 = vmul.f32 2.0, %v2920_v8  ;;  %v1620_v58 = vadd.f32 %v1588_v47, %v1540_v33 }
 0x17b   : > { %v1612_v37 = vadd.f32 %v1580_v43, %v1532_v18  ;;  %v1665_v19 = vsub.f32 %v3096_v9, %v2947_v35  ;;  %v1666_v41 = vsub.f32 %v3114_v3, %v2995_v36  ;;  %v1673_v31 = vmul.f32 2.0, %v2947_v35  ;;  %v3230_v9 = vld [vmem:[#allocation14_spill] sm:$0xff] }
 0x17c   : > { %v1674_v59 = vmul.f32 2.0, %v2995_v36  ;;  %v1675_v63 = vmul.f32 2.0, %v3118_v53  ;;  %v1676_v14 = vmul.f32 2.0, %v3120_v6  ;;  %v1677_v1 = vadd.f32 0.0001, %v1669_v23  ;;  %v3231_v36 = vld [vmem:[#allocation15_spill] sm:$0xff] }
 0x17d   : > { %v1660_v34 = vsub.f32 %v1612_v37, %v1652_v12  ;;  %v1678_v46 = vadd.f32 0.0001, %v1670_v20  ;;  %v1679_v8 = vadd.f32 0.0001, %v1671_v48  ;;  %v1723_v38 = vadd.f32 0.0009, %v1659_v22 }
 0x17e   : > { %v1667_v55 = vsub.f32 %v1619_v44, %v3118_v53  ;;  %v1680_v61 = vadd.f32 0.0001, %v1672_v5  ;;  %v1709_v52 = vadd.f32 0.0001, %v3230_v9  ;;  %v1668_v0 = vsub.f32 %v1620_v58, %v3120_v6 }
 0x17f   : > { %v1685_v35 = vmul.f32 2.0, %v1661_v54  ;;  %v1710_v13 = vadd.f32 0.0001, %v3231_v36  ;;  %v1711_v40 = vadd.f32 0.0001, %v3232_v60  ;;  %v1686_v4 = vmul.f32 2.0, %v1662_v11 }
 0x180   : > { %v1712_v56 = vadd.f32 0.0001, %v3233_v2  ;;  %v1713_v30 = vadd.f32 0.0001, %v3050_v57  ;;  %v1725_v50 = vmul.f32 %v3234_v27, %v1709_v52  ;;  %v1724_v32 = vadd.f32 0.0009, %v1660_v34 }
 0x181   : > { %v1714_v25 = vadd.f32 0.0001, %v3058_v62  ;;  %v1726_v3 = vmul.f32 %v3235_v49, %v1710_v13  ;;  %v1727_v24 = vmul.f32 %v3236_v10, %v1711_v40  ;;  %v1715_v7 = vadd.f32 0.0001, %v1651_v28 }
 0x182   : > { %v1728_v54 = vmul.f32 %v3237_v39, %v1712_v56  ;;  %v1729_v45 = vmul.f32 %v3105_v21, %v1713_v30  ;;  %2089 = vrcp.f32 %v1725_v50  ;;  %v1687_v16 = vmul.f32 2.0, %v1663_v51 }
 0x183   : > { %v1716_v53 = vadd.f32 0.0001, %v1652_v12  ;;  %v1730_v6 = vmul.f32 %v3107_v42, %v1714_v25  ;;  %2091 = vrcp.f32 %v1726_v3  ;;  %v1688_v57 = vmul.f32 2.0, %v1664_v15 }
 0x184   : > { %v1689_v47 = vmul.f32 2.0, %v1665_v19  ;;  %v1731_v17 = vmul.f32 %v1723_v38, %v1715_v7  ;;  %2093 = vrcp.f32 %v1727_v24  ;;  %v1681_v62 = vadd.f32 0.0001, %v1673_v31 }
 0x185   : > { %v1690_v33 = vmul.f32 2.0, %v1666_v41  ;;  %v1732_v44 = vmul.f32 %v1724_v32, %v1716_v53  ;;  %2095 = vrcp.f32 %v1728_v54  ;;  %v1691_v29 = vmul.f32 2.0, %v1667_v55 }
 0x186   : > { %v1692_v26 = vmul.f32 2.0, %v1668_v0  ;;  %v1693_v43 = vadd.f32 0.0009, %v1685_v35  ;;  %2097 = vrcp.f32 %v1729_v45  ;;  %v1682_v28 = vadd.f32 0.0001, %v1674_v59 }
 0x187   : > { %v1694_v21 = vadd.f32 0.0009, %v1686_v4  ;;  %v1695_v11 = vadd.f32 0.0009, %v1687_v16  ;;  %2099 = vrcp.f32 %v1730_v6  ;;  %v1683_v18 = vadd.f32 0.0001, %v1675_v63 }
 0x188   : > { %v2090_v12 = vpop.eup %2089  ;;  %v1696_v42 = vadd.f32 0.0009, %v1688_v57  ;;  %v1697_v23 = vadd.f32 0.0009, %v1689_v47  ;;  %2101 = vrcp.f32 %v1731_v17  ;;  %v1684_v48 = vadd.f32 0.0001, %v1676_v14 }
 0x189   : > { %v2092_v20 = vpop.eup %2091  ;;  %v1698_v22 = vadd.f32 0.0009, %v1690_v33  ;;  %2103 = vrcp.f32 %v1732_v44  ;;  %v1741_v51 = vmul.f32 %v2090_v12, %v1725_v50  ;;  %v1699_v5 = vadd.f32 0.0009, %v1691_v29 }
 0x18a   : > { %v2094_v15 = vpop.eup %2093  ;;  %v1700_v58 = vadd.f32 0.0009, %v1692_v26  ;;  %v1701_v37 = vmul.f32 %v1693_v43, %v1677_v1  ;;  %v1742_v19 = vmul.f32 %v2092_v20, %v1726_v3  ;;  %v1702_v31 = vmul.f32 %v1694_v21, %v1678_v46 }
 0x18b   : > { %v2096_v41 = vpop.eup %2095  ;;  %v1703_v59 = vmul.f32 %v1695_v11, %v1679_v8  ;;  %v1743_v34 = vmul.f32 %v2094_v15, %v1727_v24  ;;  %v1749_v38 = vsub.f32 2.0, %v1741_v51  ;;  %v1704_v63 = vmul.f32 %v1696_v42, %v1680_v61 }
 0x18c   : > { %v2098_v55 = vpop.eup %2097  ;;  %v1705_v9 = vmul.f32 %v1697_v23, %v1681_v62  ;;  %v1744_v52 = vmul.f32 %v2096_v41, %v1728_v54  ;;  %v1750_v0 = vsub.f32 2.0, %v1742_v19  ;;  %v1706_v14 = vmul.f32 %v1698_v22, %v1682_v28 }
 0x18d   : > { %v2100_v35 = vpop.eup %2099  ;;  %v1745_v36 = vmul.f32 %v2098_v55, %v1729_v45  ;;  %v1751_v13 = vsub.f32 2.0, %v1743_v34  ;;  %v1757_v60 = vmul.f32 %v2090_v12, %v1749_v38  ;;  %v1707_v4 = vmul.f32 %v1699_v5, %v1683_v18 }
 0x18e   : > { %v2102_v40 = vpop.eup %2101  ;;  %v1746_v2 = vmul.f32 %v2100_v35, %v1730_v6  ;;  %v1752_v1 = vsub.f32 2.0, %v1744_v52  ;;  %v1758_v56 = vmul.f32 %v2092_v20, %v1750_v0  ;;  %v1708_v53 = vmul.f32 %v1700_v58, %v1684_v48 }
 0x18f   : > { %v2104_v30 = vpop.eup %2103  ;;  %v1747_v46 = vmul.f32 %v2102_v40, %v1731_v17  ;;  %v1753_v8 = vsub.f32 2.0, %v1745_v36  ;;  %v1759_v27 = vmul.f32 %v2094_v15, %v1751_v13  ;;  %v1765_v50 = vmul.f32 %v1757_v60, %v1701_v37 }
 0x190   : > { %v1748_v32 = vmul.f32 %v2104_v30, %v1732_v44  ;;  %v1754_v61 = vsub.f32 2.0, %v1746_v2  ;;  %v1760_v25 = vmul.f32 %v2096_v41, %v1752_v1  ;;  %v1766_v49 = vmul.f32 %v1758_v56, %v1702_v31 }
 0x191   : > { %v1755_v3 = vsub.f32 2.0, %v1747_v46  ;;  %v1761_v10 = vmul.f32 %v2098_v55, %v1753_v8  ;;  %v1767_v24 = vmul.f32 %v1759_v27, %v1703_v59  ;;  %v1773_v7 = vsel %vm289_vm0, %v1765_v50, 0.0 }
 0x192   : > { %v1756_v39 = vsub.f32 2.0, %v1748_v32  ;;  %v1762_v54 = vmul.f32 %v2100_v35, %v1754_v61  ;;  %v1768_v45 = vmul.f32 %v1760_v25, %v1704_v63  ;;  %v1774_v16 = vsel %vm289_vm0, %v1766_v49, 0.0 }
 0x193   : > { %v1763_v6 = vmul.f32 %v2102_v40, %v1755_v3  ;;  %v1769_v57 = vmul.f32 %v1761_v10, %v1705_v9  ;;  %v1775_v47 = vadd.f32 %v1774_v16, %v1773_v7  ;;  %v1784_v33 = vsel %vm289_vm0, %v1767_v24, 0.0 }
 0x194   : > { %v1764_v17 = vmul.f32 %v2104_v30, %v1756_v39  ;;  %v1770_v62 = vmul.f32 %v1762_v54, %v1706_v14  ;;  %v1785_v44 = vsel %vm289_vm0, %v1768_v45, 0.0 }
 0x195   : > { %v1771_v29 = vmul.f32 %v1763_v6, %v1707_v4  ;;  %v1776_v26 = vrot.slane %v1775_v47, 4  ;;  %v1786_v43 = vadd.f32 %v1785_v44, %v1784_v33  ;;  %v1794_v21 = vsel %vm289_vm0, %v1769_v57, 0.0 }
 0x196   : > { %v1772_v28 = vmul.f32 %v1764_v17, %v1708_v53  ;;  %v1795_v11 = vsel %vm289_vm0, %v1770_v62, 0.0 }
 0x197   : > { %v1777_v12 = vadd.f32 %v1776_v26, %v1775_v47  ;;  %v1787_v18 = vrot.slane %v1786_v43, 4  ;;  %v1796_v42 = vadd.f32 %v1795_v11, %v1794_v21  ;;  %v1804_v23 = vsel %vm289_vm0, %v1771_v29, 0.0 }
 0x198   : > { %v1805_v20 = vsel %vm289_vm0, %v1772_v28, 0.0 }
 0x199   : > { %v1778_v48 = vrot.slane %v1777_v12, 2  ;;  %v1788_v22 = vadd.f32 %v1787_v18, %v1786_v43  ;;  %v1797_v51 = vrot.slane %v1796_v42, 4  ;;  %v1806_v15 = vadd.f32 %v1805_v20, %v1804_v23 }
 0x19b   : > { %v1779_v5 = vadd.f32 %v1778_v48, %v1777_v12  ;;  %v1789_v58 = vrot.slane %v1788_v22, 2  ;;  %v1798_v37 = vadd.f32 %v1797_v51, %v1796_v42  ;;  %v1807_v19 = vrot.slane %v1806_v15, 4 }
 0x19d   : > { %v1780_v41 = vrot.slane %v1779_v5, 1  ;;  %v1790_v31 = vadd.f32 %v1789_v58, %v1788_v22  ;;  %v1799_v59 = vrot.slane %v1798_v37, 2  ;;  %v1808_v34 = vadd.f32 %v1807_v19, %v1806_v15 }
 0x19f   : > { %v1781_v38 = vadd.f32 %v1780_v41, %v1779_v5  ;;  %v1791_v55 = vrot.slane %v1790_v31, 1  ;;  %v1800_v63 = vadd.f32 %v1799_v59, %v1798_v37  ;;  %v1809_v9 = vrot.slane %v1808_v34, 2 }
 0x1a1   : > { %1783 = vst.msk [vmem:[%s270_s22] sm:$0x1] %vm1782_vm1, %v1781_v38  ;;  %v1792_v52 = vadd.f32 %v1791_v55, %v1790_v31  ;;  %v1801_v0 = vrot.slane %v1800_v63, 1  ;;  %v1810_v35 = vadd.f32 %v1809_v9, %v1808_v34 }
 0x1a3   : > { %1793 = vst.msk [vmem:[%s270_s22 + $0x1] sm:$0x1] %vm1782_vm1, %v1792_v52  ;;  %v1802_v14 = vadd.f32 %v1801_v0, %v1800_v63  ;;  %v1811_v36 = vrot.slane %v1810_v35, 1 }
 0x1a5   : > { %1803 = vst.msk [vmem:[%s270_s22 + $0x2] sm:$0x1] %vm1782_vm1, %v1802_v14  ;;  %v1812_v13 = vadd.f32 %v1811_v36, %v1810_v35 }
 0x1a7   : > { %1813 = vst.msk [vmem:[%s270_s22 + $0x3] sm:$0x1] %vm1782_vm1, %v1812_v13 }
 0x1a8   : > { %2222 = shalt.err (!%p2219_p13)
}
 0x1a9   : > { %2016 = dma.vmem_to_hbm [thread:$0]  (%p2399_p0), %s1829_s15, 64, %s1831_s29, %s1815_s30  }
 0x1aa PF: > { %s1842_s6 = sand.u32 1, %s2261_s12   ;;  %p2030_p3 = pnand %p1952_p4, %p2403_p2 }
 0x1ab   : > { %s1843_s11 = scalar_lea.sflag [#allocation6], %s1842_s6 }
 0x1ac   : > { %p2031_p5 = pneg %p2030_p3 }
 0x1ae   : > { %2256 = dma.done.wait (%p2031_p5), %s1843_s11, 64  }
 0x1af   : > { %2258 = vsyncadd (%p2031_p5), %s1843_s11, 4294967232  ;;  %s20_s17 = sadd.s32 1, %s2281_s17   ;;  %s3238_s12 = smov %s2265_s13 }
 0x1b0   : > { %p17_p6 = scmp.ge.s32.totalorder %s20_s17, 4   ;;  %s3239_s13 = smov %s2269_s14 }
 0x1b1   : > { %s3240_s14 = smov %s2358_s24  ;;  %s3241_s15 = smov %s2277_s16 }
 0x1b2   : > { %s3242_s16 = smov %s3244_s18  ;;  %19 = sbr.rel (!%p17_p6) target bundleno = 7 (0x7), region = 93 }
 0x1b7   :  { %1849 = vsyncpa [#allocation5], 1 }
 0x1b8   :  { %1851 = vsyncpa [#allocation5 + $0x1], 1 }
 0x1b9   :  { %1852 = vsyncpa [#allocation8], 1 }
 0x1ba   :  { %1854 = vsyncpa [#allocation8 + $0x1], 1 }
 0x1bb   :  { %1855 = vsyncpa [#allocation6], 1 }
 0x1bc   :  { %1857 = vsyncpa [#allocation6 + $0x1], 1 }

</bundles_post_ra>
